<compile_context>
chip_gen: v7x
topology: tpu7x:2x2x1
jax: 0.10.0
libtpu: 0.0.40
codegen_flags: <defaults>
</compile_context>

<pallas_src>
import functools

import numpy as np
import jax
import jax.numpy as jnp
from jax.experimental import pallas as pl
from jax.experimental.pallas import tpu as pltpu


# ----------------------------------------------------------------------------
# Static layout of the packed f32 parameter slab (rows x 128 lanes)
# ----------------------------------------------------------------------------
def _fslab_offsets(N, H):
    r8 = lambda v: ((v + 7) // 8) * 8
    r_gmat = 8                         # rows 0..3 hold b1, b2, b3, fc_b
    r_wih = r8(r_gmat + N)
    r_whh = r8(r_wih + N)
    r_fcw = r8(r_whh + H)
    rows = r8(r_fcw + H)
    return r_gmat, r_wih, r_whh, r_fcw, rows


def _hard_onehot(logits):
    """one_hot(argmax(logits)) with first-index tie-break (matches torch scatter)."""
    n = logits.shape[-1]
    m = jnp.max(logits, axis=-1, keepdims=True)
    col = jax.lax.broadcasted_iota(jnp.int32, logits.shape, logits.ndim - 1)
    cand = jnp.where(logits == m, col, n)
    first = jnp.min(cand, axis=-1, keepdims=True)
    return (col == first).astype(logits.dtype)


# ----------------------------------------------------------------------------
# The single fused kernel
# ----------------------------------------------------------------------------
def _fused_kernel(p1_ref, gum_ref, gth_ref, wslab_ref, fslab_ref, o_ref,
                  pp_sc, lstm_sc, *, B, N, T, H, D, F1, F2, KK, P2):
    f32 = jnp.float32
    bf16 = jnp.bfloat16

    # ---- packed parameters (static slices, lane-dense slabs)
    b1 = fslab_ref[0:1, :][:, 0:F1]
    b2 = fslab_ref[1:2, :][:, 0:F2]
    b3 = fslab_ref[2:3, :][:, 0:N]
    fcb = fslab_ref[3:4, :][:, 0:D]
    r_gmat, r_wih, r_whh, r_fcw, _ = _fslab_offsets(N, H)
    gmat = fslab_ref[r_gmat:r_gmat + N, :][:, 0:N]            # (N, N)
    wih = fslab_ref[r_wih:r_wih + N, :][:, 0:4 * H]           # (N, 4H) gates [i|f|g|o]
    whh = fslab_ref[r_whh:r_whh + H, :][:, 0:4 * H]           # (H, 4H)
    fcw = fslab_ref[r_fcw:r_fcw + H, :][:, 0:D]               # (H, D)

    # ---- conv1: im2col GEMM (patches built host-side from the raw image),
    #      bias, LeakyReLU(0.2).  Output rows are (b, h, w), cols = F1 channels.
    w1 = wslab_ref[0:KK, :][:, 0:F1]                          # (k*k, F1) bf16
    y1 = jnp.dot(p1_ref[...], w1, preferred_element_type=f32) + b1
    a1 = jnp.where(y1 > 0, y1, 0.2 * y1).astype(bf16)         # (B*OH1*OW1, F1)

    # ---- conv2 im2col fully in-kernel: one 0/1 gather GEMM builds, for every
    #      kernel offset o=(ki,kj), the (P2*B, F1) block of shifted conv1
    #      activations (all-zero rows realise the zero padding).
    #      Row order of pp is (o, p, b) with p = conv2 output position.
    pp_sc[...] = jnp.dot(gth_ref[...], a1,
                         preferred_element_type=f32).astype(bf16)

    rows_o = P2 * B
    w2_base = KK
    acc2 = jnp.zeros((rows_o, F2), f32)
    for o in range(KK):                                       # 16 accumulating GEMMs
        po = pp_sc[o * rows_o:(o + 1) * rows_o, :]            # (P2*B, F1) bf16
        w2o = wslab_ref[w2_base + o * F1:w2_base + (o + 1) * F1, :][:, 0:F2]
        acc2 = acc2 + jnp.dot(po, w2o, preferred_element_type=f32)
    y2 = acc2 + b2                                            # (P2*B, F2), rows (p, b)

    # BatchNorm2d (training mode): full-batch per-channel stats (all rows are in
    # this single block, so the statistics are exact), gamma=1, beta=0, eps=1e-5.
    mu = jnp.mean(y2, axis=0, keepdims=True)
    var = jnp.mean((y2 - mu) ** 2, axis=0, keepdims=True)
    y2 = (y2 - mu) * jax.lax.rsqrt(var + 1e-5)
    a2 = jnp.where(y2 > 0, y2, 0.2 * y2).astype(bf16)         # LeakyReLU(0.2)

    # ---- conv3 (k=4, s=1, p=0 covers the whole 4x4 map): sum over positions p
    #      of (B,F2)@(F2,N), then bias + sigmoid -> encoder logits.
    w3_base = KK + KK * F1
    acc3 = jnp.zeros((B, N), f32)
    for p in range(P2):
        a2p = a2[p * B:(p + 1) * B, :]                        # rows (p, b=0..B-1)
        w3p = wslab_ref[w3_base + p * F2:w3_base + (p + 1) * F2, :][:, 0:N]
        acc3 = acc3 + jnp.dot(a2p, w3p, preferred_element_type=f32)
    logits = jax.nn.sigmoid(acc3 + b3)                        # (B, N)

    # ---- DifferentiableGrammar: gumbel hard one-hot chain; terminal rows
    #      (last symbol set) keep their symbol.  Only the final step matters
    #      because of the batch_first LSTM quirk below.
    onehot = _hard_onehot(logits + gum_ref[0])
    for t in range(1, T):
        step_logits = jnp.dot(onehot, gmat, preferred_element_type=f32) + gum_ref[t]
        new = _hard_onehot(step_logits)
        terminal = onehot[:, N - 1:N] != 0.0
        onehot = jnp.where(terminal, onehot, new)

    # ---- LSTM: batch_first=True fed a (T, B, N) tensor => only sequence[T-1]
    #      reaches the output, processed with the batch axis as the sequence and
    #      zero initial state.  b_ih / b_hh are zeroed in the module __init__.
    #      Input-to-hidden GEMM hoisted out of the recurrence (review item).
    xg = jnp.dot(onehot, wih, preferred_element_type=f32)     # (B, 4H)
    h = jnp.zeros((1, H), f32)
    c = jnp.zeros((1, H), f32)
    for s in range(B):                                        # tiny fixed trip count
        gates = xg[s:s + 1, :] + jnp.dot(h, whh, preferred_element_type=f32)
        i_g = jax.nn.sigmoid(gates[:, 0:H])                   # PyTorch gate order i,f,g,o
        f_g = jax.nn.sigmoid(gates[:, H:2 * H])
        g_g = jnp.tanh(gates[:, 2 * H:3 * H])
        o_g = jax.nn.sigmoid(gates[:, 3 * H:4 * H])
        c = f_g * c + i_g * g_g
        h = o_g * jnp.tanh(c)
        lstm_sc[s:s + 1, :] = h

    # ---- Linear + Tanh + log_softmax(dim=1)
    z = jnp.tanh(jnp.dot(lstm_sc[...], fcw, preferred_element_type=f32) + fcb)
    m = jnp.max(z, axis=-1, keepdims=True)
    lse = jnp.log(jnp.sum(jnp.exp(z - m), axis=-1, keepdims=True)) + m
    o_ref[...] = z - lse


def fused_classifier_pallas(p1, gum, gather, wslab, fslab, *,
                            B, N, T, H, D, F1, F2, KK, P2):
    kernel = functools.partial(_fused_kernel, B=B, N=N, T=T, H=H, D=D,
                               F1=F1, F2=F2, KK=KK, P2=P2)
    flops = 2 * (p1.shape[0] * p1.shape[1] * F1
                 + gather.shape[0] * gather.shape[1] * F1
                 + KK * P2 * B * F1 * F2
                 + P2 * B * F2 * N
                 + (T - 1) * B * N * N
                 + B * N * 4 * H + B * H * 4 * H + B * H * D)
    bytes_in = sum(int(a.size) * a.dtype.itemsize
                   for a in (p1, gum, gather, wslab, fslab))
    cost = pl.CostEstimate(flops=flops,
                           transcendentals=B * (N + 6 * H + 2 * D),
                           bytes_accessed=bytes_in + B * D * 4)
    return pl.pallas_call(
        kernel,
        out_shape=jax.ShapeDtypeStruct((B, D), jnp.float32),
        grid=(1,),
        in_specs=[pl.BlockSpec(p1.shape, lambda i: (0, 0)),
                  pl.BlockSpec(gum.shape, lambda i: (0, 0, 0)),
                  pl.BlockSpec(gather.shape, lambda i: (0, 0)),
                  pl.BlockSpec(wslab.shape, lambda i: (0, 0)),
                  pl.BlockSpec(fslab.shape, lambda i: (0, 0))],
        out_specs=pl.BlockSpec((B, D), lambda i: (0, 0)),
        scratch_shapes=[pltpu.VMEM((KK * P2 * B, F1), jnp.bfloat16),
                        pltpu.VMEM((B, H), jnp.float32)],
        compiler_params=pltpu.CompilerParams(dimension_semantics=("arbitrary",)),
        cost_estimate=cost,
    )(p1, gum, gather, wslab, fslab)


# ----------------------------------------------------------------------------
# Host-side (per-call) prep: conv1 im2col of the raw image, bf16 before gather
# ----------------------------------------------------------------------------
def _conv1_patches(x, k=4, stride=2, pad=1):
    """x: (B, H, W) single channel.  Rows (b, oh, ow); cols (ki, kj)."""
    B, Hh, Ww = x.shape
    OH = (Hh + 2 * pad - k) // stride + 1
    OW = (Ww + 2 * pad - k) // stride + 1
    xp = jnp.pad(x, ((0, 0), (pad, pad), (pad, pad)))
    cols = []
    for ki in range(k):
        for kj in range(k):
            cols.append(xp[:, ki:ki + stride * OH:stride, kj:kj + stride * OW:stride])
    p = jnp.stack(cols, axis=-1)                              # (B, OH, OW, k*k)
    return p.reshape(B * OH * OW, k * k), OH, OW


# ----------------------------------------------------------------------------
# Host-side (one-time) constant prep: gather matrix + packed parameter slabs
# ----------------------------------------------------------------------------
def _build_conv2_gather(B, H2, W2, k=4, stride=2, pad=1):
    """0/1 matrix turning conv1-output rows (b,h,w) into conv2 im2col rows (o,p,b)."""
    OH = (H2 + 2 * pad - k) // stride + 1
    OW = (W2 + 2 * pad - k) // stride + 1
    KK, P2 = k * k, OH * OW
    G = np.zeros((KK * P2 * B, B * H2 * W2), np.float32)
    for ki in range(k):
        for kj in range(k):
            o = ki * k + kj
            for oh in range(OH):
                for ow in range(OW):
                    p = oh * OW + ow
                    hh = stride * oh + ki - pad
                    ww = stride * ow + kj - pad
                    if 0 <= hh < H2 and 0 <= ww < W2:
                        for b in range(B):
                            G[o * P2 * B + p * B + b,
                              b * H2 * W2 + hh * W2 + ww] = 1.0
    return jnp.asarray(G, jnp.bfloat16), OH, OW, KK, P2


def pack_constants(params, *, batch, spatial, N, H, D):
    F1 = params["conv1_w"].shape[0]
    F2 = params["conv2_w"].shape[0]
    k = params["conv1_w"].shape[-1]
    KK = k * k
    assert 4 * H <= 128 and max(N, D, F1, F2) <= 128

    # bf16 GEMM-weight slab: rows = [w1 | w2 | w3], each flattened (kh, kw, cin).
    w1 = jnp.transpose(params["conv1_w"], (2, 3, 1, 0)).reshape(KK * 1, F1)
    w2 = jnp.transpose(params["conv2_w"], (2, 3, 1, 0)).reshape(KK * F1, F2)
    w3 = jnp.transpose(params["out_w"], (2, 3, 1, 0)).reshape(KK * F2, N)
    wl = max(F1, F2, N)
    padw = lambda w: jnp.pad(w, ((0, 0), (0, wl - w.shape[1])))
    wslab = jnp.concatenate([padw(w1), padw(w2), padw(w3)], axis=0).astype(jnp.bfloat16)

    # f32 small-parameter slab, 128 lanes wide (biases, grammar, LSTM, head).
    r_gmat, r_wih, r_whh, r_fcw, rows = _fslab_offsets(N, H)
    fslab = jnp.zeros((rows, 128), jnp.float32)
    fslab = fslab.at[0, 0:F1].set(params["conv1_b"])
    fslab = fslab.at[1, 0:F2].set(params["conv2_b"])
    fslab = fslab.at[2, 0:N].set(params["out_b"])
    fslab = fslab.at[3, 0:D].set(params["fc_b"])
    fslab = fslab.at[r_gmat:r_gmat + N, 0:N].set(params["grammar_mat"])
    fslab = fslab.at[r_wih:r_wih + N, 0:4 * H].set(params["wih"])
    fslab = fslab.at[r_whh:r_whh + H, 0:4 * H].set(params["whh"])
    fslab = fslab.at[r_fcw:r_fcw + H, 0:D].set(params["fc_w_t"])

    OH1 = (spatial + 2 * 1 - k) // 2 + 1
    gather, OH2, OW2, KK2, P2 = _build_conv2_gather(batch, OH1, OH1, k=k)
    assert KK2 == KK and OH2 == k and OW2 == k   # conv3 covers the full map -> 1x1 output

    const = {"gather": gather, "wslab": wslab, "fslab": fslab}
    dims = {"F1": F1, "F2": F2, "KK": KK, "P2": P2}
    return const, dims


# ----------------------------------------------------------------------------
# Full Classifier forward: one tiny XLA prep fusion + ONE pallas_call
# ----------------------------------------------------------------------------
def classifier_forward(const, x_nchw, gumbel_key, *, N, T, H, D, F1, F2, KK, P2):
    B = x_nchw.shape[0]
    x = x_nchw[:, 0, :, :].astype(jnp.bfloat16)               # single-channel, bf16 patches
    p1, _, _ = _conv1_patches(x)                              # (B*OH1*OW1, k*k)
    assert p1.shape[0] == const["gather"].shape[1]
    # TODO(synk): torch's CUDA RNG stream cannot be matched bit-exactly; gumbel noise
    # is drawn with jax.random (same distribution, deterministic via PRNGKey).
    gum = jax.random.gumbel(gumbel_key, (T, B, N), jnp.float32)
    return fused_classifier_pallas(p1, gum, const["gather"], const["wslab"],
                                   const["fslab"], B=B, N=N, T=T, H=H, D=D,
                                   F1=F1, F2=F2, KK=KK, P2=P2)


# ----------------------------------------------------------------------------
# Deterministic parameter initialization (shapes per the PyTorch __init__)
# ----------------------------------------------------------------------------
def init_params(key, num_filters, N, hidden, output_dim):
    f1, f2 = num_filters[::-1]                 # Encoder receives the reversed list
    ks = jax.random.split(key, 7)
    p = {}
    p["conv1_w"] = 0.02 * jax.random.normal(ks[0], (f1, 1, 4, 4), jnp.float32)
    p["conv1_b"] = jnp.zeros((f1,), jnp.float32)
    p["conv2_w"] = 0.02 * jax.random.normal(ks[1], (f2, f1, 4, 4), jnp.float32)
    p["conv2_b"] = jnp.zeros((f2,), jnp.float32)
    p["out_w"] = 0.02 * jax.random.normal(ks[2], (N, f2, 4, 4), jnp.float32)
    p["out_b"] = jnp.zeros((N,), jnp.float32)
    p["grammar_mat"] = jnp.ones((N, N), jnp.float32) / float(N)

    def xavier_uniform(k, shape):              # shape = (fan_out, fan_in)
        bound = (6.0 / (shape[0] + shape[1])) ** 0.5
        return jax.random.uniform(k, shape, jnp.float32, -bound, bound)

    # LSTM weights stored pre-transposed & gate-fused: columns = [i | f | g | o];
    # b_ih / b_hh are zeroed in the module __init__.
    p["wih"] = xavier_uniform(ks[3], (4 * hidden, N)).T        # (N, 4H)
    p["whh"] = xavier_uniform(ks[4], (4 * hidden, hidden)).T   # (H, 4H)

    bound = 1.0 / (hidden ** 0.5)              # PyTorch default Linear init
    p["fc_w_t"] = jax.random.uniform(ks[5], (output_dim, hidden), jnp.float32,
                                     -bound, bound).T          # (H, D)
    p["fc_b"] = jax.random.uniform(ks[6], (output_dim,), jnp.float32, -bound, bound)
    return p


if __name__ == "__main__":
    B, N, T, HIDDEN, OUT_DIM = 2, 12, 6, 32, 10   # 4*HIDDEN = 128 (lane-dense gates)
    num_filters = [32, 16]                        # Classifier arg; Encoder uses [16, 32]
    SPATIAL = 16

    key = jax.random.PRNGKey(0)
    k_param, k_x, k_gum = jax.random.split(key, 3)
    params = init_params(k_param, num_filters, N, HIDDEN, OUT_DIM)
    const, dims = pack_constants(params, batch=B, spatial=SPATIAL,
                                 N=N, H=HIDDEN, D=OUT_DIM)

    x = jax.random.normal(k_x, (B, 1, SPATIAL, SPATIAL), jnp.float32)

    fwd = jax.jit(functools.partial(classifier_forward,
                                    N=N, T=T, H=HIDDEN, D=OUT_DIM, **dims))
    out = jax.block_until_ready(fwd(const, x, k_gum))

    assert out.shape == (B, OUT_DIM)
    assert bool(jnp.all(jnp.isfinite(out)))
    # log_softmax rows must exponentiate to a probability distribution
    assert bool(jnp.allclose(jnp.sum(jnp.exp(out), axis=1), 1.0, atol=1e-3))
    print("KERNEL_OK")
</pallas_src>

<mosaic_0001>
module attributes {stable_mosaic.version = 11 : i64} {
  func.func @_fused_kernel(%arg0: i32, %arg1: memref<128x16xbf16, #tpu.memory_space<vmem>>, %arg2: memref<6x2x12xf32, #tpu.memory_space<vmem>>, %arg3: memref<512x128xbf16, #tpu.memory_space<vmem>>, %arg4: memref<784x32xbf16, #tpu.memory_space<vmem>>, %arg5: memref<104x128xf32, #tpu.memory_space<vmem>>, %arg6: memref<2x10xf32, #tpu.memory_space<vmem>>, %arg7: memref<512x16xbf16, #tpu.memory_space<vmem>>, %arg8: memref<2x32xf32, #tpu.memory_space<vmem>>) attributes {dimension_semantics = [#tpu.dimension_semantics<arbitrary>], iteration_bounds = array<i64: 1>, scalar_prefetch = 0 : i64, scratch_operands = 2 : i64, tpu.core_type = #tpu.core_type<tc>, window_params = [{pipeline_mode = #tpu.pipeline_mode<synchronous>, transform_indices = @transform_0, window_bounds = array<i64: 128, 16>}, {pipeline_mode = #tpu.pipeline_mode<synchronous>, transform_indices = @transform_1, window_bounds = array<i64: 6, 2, 12>}, {pipeline_mode = #tpu.pipeline_mode<synchronous>, transform_indices = @transform_2, window_bounds = array<i64: 512, 128>}, {pipeline_mode = #tpu.pipeline_mode<synchronous>, transform_indices = @transform_3, window_bounds = array<i64: 784, 32>}, {pipeline_mode = #tpu.pipeline_mode<synchronous>, transform_indices = @transform_4, window_bounds = array<i64: 104, 128>}, {pipeline_mode = #tpu.pipeline_mode<synchronous>, transform_indices = @transform_5, window_bounds = array<i64: 2, 10>}]} {
    %c0 = arith.constant 0 : index
    %c0_0 = arith.constant 0 : index
    %0 = vector.load %arg5[%c0, %c0_0] : memref<104x128xf32, #tpu.memory_space<vmem>>, vector<1x128xf32>
    %1 = vector.extract_strided_slice %0 {offsets = [0, 0], sizes = [1, 16], strides = [1, 1]} : vector<1x128xf32> to vector<1x16xf32>
    %c1 = arith.constant 1 : index
    %c0_1 = arith.constant 0 : index
    %2 = vector.load %arg5[%c1, %c0_1] : memref<104x128xf32, #tpu.memory_space<vmem>>, vector<1x128xf32>
    %3 = vector.extract_strided_slice %2 {offsets = [0, 0], sizes = [1, 32], strides = [1, 1]} : vector<1x128xf32> to vector<1x32xf32>
    %c2 = arith.constant 2 : index
    %c0_2 = arith.constant 0 : index
    %4 = vector.load %arg5[%c2, %c0_2] : memref<104x128xf32, #tpu.memory_space<vmem>>, vector<1x128xf32>
    %5 = vector.extract_strided_slice %4 {offsets = [0, 0], sizes = [1, 12], strides = [1, 1]} : vector<1x128xf32> to vector<1x12xf32>
    %c3 = arith.constant 3 : index
    %c0_3 = arith.constant 0 : index
    %6 = vector.load %arg5[%c3, %c0_3] : memref<104x128xf32, #tpu.memory_space<vmem>>, vector<1x128xf32>
    %7 = vector.extract_strided_slice %6 {offsets = [0, 0], sizes = [1, 10], strides = [1, 1]} : vector<1x128xf32> to vector<1x10xf32>
    %c8 = arith.constant 8 : index
    %c0_4 = arith.constant 0 : index
    %8 = vector.load %arg5[%c8, %c0_4] : memref<104x128xf32, #tpu.memory_space<vmem>>, vector<12x128xf32>
    %9 = vector.extract_strided_slice %8 {offsets = [0, 0], sizes = [12, 12], strides = [1, 1]} : vector<12x128xf32> to vector<12x12xf32>
    %c24 = arith.constant 24 : index
    %c0_5 = arith.constant 0 : index
    %10 = vector.load %arg5[%c24, %c0_5] : memref<104x128xf32, #tpu.memory_space<vmem>>, vector<12x128xf32>
    %c40 = arith.constant 40 : index
    %c0_6 = arith.constant 0 : index
    %11 = vector.load %arg5[%c40, %c0_6] : memref<104x128xf32, #tpu.memory_space<vmem>>, vector<32x128xf32>
    %c72 = arith.constant 72 : index
    %c0_7 = arith.constant 0 : index
    %12 = vector.load %arg5[%c72, %c0_7] : memref<104x128xf32, #tpu.memory_space<vmem>>, vector<32x128xf32>
    %13 = vector.extract_strided_slice %12 {offsets = [0, 0], sizes = [32, 10], strides = [1, 1]} : vector<32x128xf32> to vector<32x10xf32>
    %c0_8 = arith.constant 0 : index
    %c0_9 = arith.constant 0 : index
    %14 = vector.load %arg4[%c0_8, %c0_9] : memref<784x32xbf16, #tpu.memory_space<vmem>>, vector<16x32xbf16>
    %15 = vector.extract_strided_slice %14 {offsets = [0, 0], sizes = [16, 16], strides = [1, 1]} : vector<16x32xbf16> to vector<16x16xbf16>
    %c0_10 = arith.constant 0 : index
    %c0_11 = arith.constant 0 : index
    %16 = vector.load %arg1[%c0_10, %c0_11] : memref<128x16xbf16, #tpu.memory_space<vmem>>, vector<128x16xbf16>
    %cst = arith.constant dense<0.000000e+00> : vector<128x16xf32>
    %17 = tpu.matmul %16, %15, %cst {dimension_numbers = #tpu.dot_dimension_numbers<[1], [0], [0], [1], [0, 0, 1, 1], [], []>} : vector<128x16xbf16>, vector<16x16xbf16>, vector<128x16xf32> -> vector<128x16xf32>
    %18 = vector.broadcast %1 : vector<1x16xf32> to vector<128x16xf32>
    %19 = arith.addf %17, %18 : vector<128x16xf32>
    %cst_12 = arith.constant 0.000000e+00 : f32
    %20 = vector.broadcast %cst_12 : f32 to vector<128x16xf32>
    %21 = arith.cmpf ogt, %19, %20 : vector<128x16xf32>
    %cst_13 = arith.constant 2.000000e-01 : f32
    %22 = vector.broadcast %cst_13 : f32 to vector<128x16xf32>
    %23 = arith.mulf %22, %19 : vector<128x16xf32>
    %24 = arith.select %21, %19, %23 : vector<128x16xi1>, vector<128x16xf32>
    %25 = arith.truncf %24 : vector<128x16xf32> to vector<128x16xbf16>
    %c0_14 = arith.constant 0 : index
    %c0_15 = arith.constant 0 : index
    %26 = vector.load %arg3[%c0_14, %c0_15] : memref<512x128xbf16, #tpu.memory_space<vmem>>, vector<512x128xbf16>
    %cst_16 = arith.constant dense<0.000000e+00> : vector<512x16xf32>
    %27 = tpu.matmul %26, %25, %cst_16 {dimension_numbers = #tpu.dot_dimension_numbers<[1], [0], [0], [1], [0, 0, 1, 1], [], []>} : vector<512x128xbf16>, vector<128x16xbf16>, vector<512x16xf32> -> vector<512x16xf32>
    %28 = arith.truncf %27 : vector<512x16xf32> to vector<512x16xbf16>
    %c0_17 = arith.constant 0 : index
    %c0_18 = arith.constant 0 : index
    %29 = vector.load %arg7[%c0_17, %c0_18] : memref<512x16xbf16, #tpu.memory_space<vmem>>, vector<512x16xbf16>
    tpu.vector_store %arg7[%c0_17, %c0_18], %28 {strides = array<i32>} : memref<512x16xbf16, #tpu.memory_space<vmem>>, vector<512x16xbf16>,
    %cst_19 = arith.constant 0.000000e+00 : f32
    %30 = vector.broadcast %cst_19 : f32 to vector<32x32xf32>
    %c0_20 = arith.constant 0 : index
    %c0_21 = arith.constant 0 : index
    %31 = vector.load %arg7[%c0_20, %c0_21] : memref<512x16xbf16, #tpu.memory_space<vmem>>, vector<32x16xbf16>
    %c16 = arith.constant 16 : index
    %c0_22 = arith.constant 0 : index
    %32 = vector.load %arg4[%c16, %c0_22] : memref<784x32xbf16, #tpu.memory_space<vmem>>, vector<16x32xbf16>
    %cst_23 = arith.constant dense<0.000000e+00> : vector<32x32xf32>
    %33 = tpu.matmul %31, %32, %cst_23 {dimension_numbers = #tpu.dot_dimension_numbers<[1], [0], [0], [1], [0, 0, 1, 1], [], []>} : vector<32x16xbf16>, vector<16x32xbf16>, vector<32x32xf32> -> vector<32x32xf32>
    %34 = arith.addf %30, %33 : vector<32x32xf32>
    %c32 = arith.constant 32 : index
    %c0_24 = arith.constant 0 : index
    %35 = vector.load %arg7[%c32, %c0_24] : memref<512x16xbf16, #tpu.memory_space<vmem>>, vector<32x16xbf16>
    %c32_25 = arith.constant 32 : index
    %c0_26 = arith.constant 0 : index
    %36 = vector.load %arg4[%c32_25, %c0_26] : memref<784x32xbf16, #tpu.memory_space<vmem>>, vector<16x32xbf16>
    %cst_27 = arith.constant dense<0.000000e+00> : vector<32x32xf32>
    %37 = tpu.matmul %35, %36, %cst_27 {dimension_numbers = #tpu.dot_dimension_numbers<[1], [0], [0], [1], [0, 0, 1, 1], [], []>} : vector<32x16xbf16>, vector<16x32xbf16>, vector<32x32xf32> -> vector<32x32xf32>
    %38 = arith.addf %34, %37 : vector<32x32xf32>
    %c64 = arith.constant 64 : index
    %c0_28 = arith.constant 0 : index
    %39 = vector.load %arg7[%c64, %c0_28] : memref<512x16xbf16, #tpu.memory_space<vmem>>, vector<32x16xbf16>
    %c48 = arith.constant 48 : index
    %c0_29 = arith.constant 0 : index
    %40 = vector.load %arg4[%c48, %c0_29] : memref<784x32xbf16, #tpu.memory_space<vmem>>, vector<16x32xbf16>
    %cst_30 = arith.constant dense<0.000000e+00> : vector<32x32xf32>
    %41 = tpu.matmul %39, %40, %cst_30 {dimension_numbers = #tpu.dot_dimension_numbers<[1], [0], [0], [1], [0, 0, 1, 1], [], []>} : vector<32x16xbf16>, vector<16x32xbf16>, vector<32x32xf32> -> vector<32x32xf32>
    %42 = arith.addf %38, %41 : vector<32x32xf32>
    %c96 = arith.constant 96 : index
    %c0_31 = arith.constant 0 : index
    %43 = vector.load %arg7[%c96, %c0_31] : memref<512x16xbf16, #tpu.memory_space<vmem>>, vector<32x16xbf16>
    %c64_32 = arith.constant 64 : index
    %c0_33 = arith.constant 0 : index
    %44 = vector.load %arg4[%c64_32, %c0_33] : memref<784x32xbf16, #tpu.memory_space<vmem>>, vector<16x32xbf16>
    %cst_34 = arith.constant dense<0.000000e+00> : vector<32x32xf32>
    %45 = tpu.matmul %43, %44, %cst_34 {dimension_numbers = #tpu.dot_dimension_numbers<[1], [0], [0], [1], [0, 0, 1, 1], [], []>} : vector<32x16xbf16>, vector<16x32xbf16>, vector<32x32xf32> -> vector<32x32xf32>
    %46 = arith.addf %42, %45 : vector<32x32xf32>
    %c128 = arith.constant 128 : index
    %c0_35 = arith.constant 0 : index
    %47 = vector.load %arg7[%c128, %c0_35] : memref<512x16xbf16, #tpu.memory_space<vmem>>, vector<32x16xbf16>
    %c80 = arith.constant 80 : index
    %c0_36 = arith.constant 0 : index
    %48 = vector.load %arg4[%c80, %c0_36] : memref<784x32xbf16, #tpu.memory_space<vmem>>, vector<16x32xbf16>
    %cst_37 = arith.constant dense<0.000000e+00> : vector<32x32xf32>
    %49 = tpu.matmul %47, %48, %cst_37 {dimension_numbers = #tpu.dot_dimension_numbers<[1], [0], [0], [1], [0, 0, 1, 1], [], []>} : vector<32x16xbf16>, vector<16x32xbf16>, vector<32x32xf32> -> vector<32x32xf32>
    %50 = arith.addf %46, %49 : vector<32x32xf32>
    %c160 = arith.constant 160 : index
    %c0_38 = arith.constant 0 : index
    %51 = vector.load %arg7[%c160, %c0_38] : memref<512x16xbf16, #tpu.memory_space<vmem>>, vector<32x16xbf16>
    %c96_39 = arith.constant 96 : index
    %c0_40 = arith.constant 0 : index
    %52 = vector.load %arg4[%c96_39, %c0_40] : memref<784x32xbf16, #tpu.memory_space<vmem>>, vector<16x32xbf16>
    %cst_41 = arith.constant dense<0.000000e+00> : vector<32x32xf32>
    %53 = tpu.matmul %51, %52, %cst_41 {dimension_numbers = #tpu.dot_dimension_numbers<[1], [0], [0], [1], [0, 0, 1, 1], [], []>} : vector<32x16xbf16>, vector<16x32xbf16>, vector<32x32xf32> -> vector<32x32xf32>
    %54 = arith.addf %50, %53 : vector<32x32xf32>
    %c192 = arith.constant 192 : index
    %c0_42 = arith.constant 0 : index
    %55 = vector.load %arg7[%c192, %c0_42] : memref<512x16xbf16, #tpu.memory_space<vmem>>, vector<32x16xbf16>
    %c112 = arith.constant 112 : index
    %c0_43 = arith.constant 0 : index
    %56 = vector.load %arg4[%c112, %c0_43] : memref<784x32xbf16, #tpu.memory_space<vmem>>, vector<16x32xbf16>
    %cst_44 = arith.constant dense<0.000000e+00> : vector<32x32xf32>
    %57 = tpu.matmul %55, %56, %cst_44 {dimension_numbers = #tpu.dot_dimension_numbers<[1], [0], [0], [1], [0, 0, 1, 1], [], []>} : vector<32x16xbf16>, vector<16x32xbf16>, vector<32x32xf32> -> vector<32x32xf32>
    %58 = arith.addf %54, %57 : vector<32x32xf32>
    %c224 = arith.constant 224 : index
    %c0_45 = arith.constant 0 : index
    %59 = vector.load %arg7[%c224, %c0_45] : memref<512x16xbf16, #tpu.memory_space<vmem>>, vector<32x16xbf16>
    %c128_46 = arith.constant 128 : index
    %c0_47 = arith.constant 0 : index
    %60 = vector.load %arg4[%c128_46, %c0_47] : memref<784x32xbf16, #tpu.memory_space<vmem>>, vector<16x32xbf16>
    %cst_48 = arith.constant dense<0.000000e+00> : vector<32x32xf32>
    %61 = tpu.matmul %59, %60, %cst_48 {dimension_numbers = #tpu.dot_dimension_numbers<[1], [0], [0], [1], [0, 0, 1, 1], [], []>} : vector<32x16xbf16>, vector<16x32xbf16>, vector<32x32xf32> -> vector<32x32xf32>
    %62 = arith.addf %58, %61 : vector<32x32xf32>
    %c256 = arith.constant 256 : index
    %c0_49 = arith.constant 0 : index
    %63 = vector.load %arg7[%c256, %c0_49] : memref<512x16xbf16, #tpu.memory_space<vmem>>, vector<32x16xbf16>
    %c144 = arith.constant 144 : index
    %c0_50 = arith.constant 0 : index
    %64 = vector.load %arg4[%c144, %c0_50] : memref<784x32xbf16, #tpu.memory_space<vmem>>, vector<16x32xbf16>
    %cst_51 = arith.constant dense<0.000000e+00> : vector<32x32xf32>
    %65 = tpu.matmul %63, %64, %cst_51 {dimension_numbers = #tpu.dot_dimension_numbers<[1], [0], [0], [1], [0, 0, 1, 1], [], []>} : vector<32x16xbf16>, vector<16x32xbf16>, vector<32x32xf32> -> vector<32x32xf32>
    %66 = arith.addf %62, %65 : vector<32x32xf32>
    %c288 = arith.constant 288 : index
    %c0_52 = arith.constant 0 : index
    %67 = vector.load %arg7[%c288, %c0_52] : memref<512x16xbf16, #tpu.memory_space<vmem>>, vector<32x16xbf16>
    %c160_53 = arith.constant 160 : index
    %c0_54 = arith.constant 0 : index
    %68 = vector.load %arg4[%c160_53, %c0_54] : memref<784x32xbf16, #tpu.memory_space<vmem>>, vector<16x32xbf16>
    %cst_55 = arith.constant dense<0.000000e+00> : vector<32x32xf32>
    %69 = tpu.matmul %67, %68, %cst_55 {dimension_numbers = #tpu.dot_dimension_numbers<[1], [0], [0], [1], [0, 0, 1, 1], [], []>} : vector<32x16xbf16>, vector<16x32xbf16>, vector<32x32xf32> -> vector<32x32xf32>
    %70 = arith.addf %66, %69 : vector<32x32xf32>
    %c320 = arith.constant 320 : index
    %c0_56 = arith.constant 0 : index
    %71 = vector.load %arg7[%c320, %c0_56] : memref<512x16xbf16, #tpu.memory_space<vmem>>, vector<32x16xbf16>
    %c176 = arith.constant 176 : index
    %c0_57 = arith.constant 0 : index
    %72 = vector.load %arg4[%c176, %c0_57] : memref<784x32xbf16, #tpu.memory_space<vmem>>, vector<16x32xbf16>
    %cst_58 = arith.constant dense<0.000000e+00> : vector<32x32xf32>
    %73 = tpu.matmul %71, %72, %cst_58 {dimension_numbers = #tpu.dot_dimension_numbers<[1], [0], [0], [1], [0, 0, 1, 1], [], []>} : vector<32x16xbf16>, vector<16x32xbf16>, vector<32x32xf32> -> vector<32x32xf32>
    %74 = arith.addf %70, %73 : vector<32x32xf32>
    %c352 = arith.constant 352 : index
    %c0_59 = arith.constant 0 : index
    %75 = vector.load %arg7[%c352, %c0_59] : memref<512x16xbf16, #tpu.memory_space<vmem>>, vector<32x16xbf16>
    %c192_60 = arith.constant 192 : index
    %c0_61 = arith.constant 0 : index
    %76 = vector.load %arg4[%c192_60, %c0_61] : memref<784x32xbf16, #tpu.memory_space<vmem>>, vector<16x32xbf16>
    %cst_62 = arith.constant dense<0.000000e+00> : vector<32x32xf32>
    %77 = tpu.matmul %75, %76, %cst_62 {dimension_numbers = #tpu.dot_dimension_numbers<[1], [0], [0], [1], [0, 0, 1, 1], [], []>} : vector<32x16xbf16>, vector<16x32xbf16>, vector<32x32xf32> -> vector<32x32xf32>
    %78 = arith.addf %74, %77 : vector<32x32xf32>
    %c384 = arith.constant 384 : index
    %c0_63 = arith.constant 0 : index
    %79 = vector.load %arg7[%c384, %c0_63] : memref<512x16xbf16, #tpu.memory_space<vmem>>, vector<32x16xbf16>
    %c208 = arith.constant 208 : index
    %c0_64 = arith.constant 0 : index
    %80 = vector.load %arg4[%c208, %c0_64] : memref<784x32xbf16, #tpu.memory_space<vmem>>, vector<16x32xbf16>
    %cst_65 = arith.constant dense<0.000000e+00> : vector<32x32xf32>
    %81 = tpu.matmul %79, %80, %cst_65 {dimension_numbers = #tpu.dot_dimension_numbers<[1], [0], [0], [1], [0, 0, 1, 1], [], []>} : vector<32x16xbf16>, vector<16x32xbf16>, vector<32x32xf32> -> vector<32x32xf32>
    %82 = arith.addf %78, %81 : vector<32x32xf32>
    %c416 = arith.constant 416 : index
    %c0_66 = arith.constant 0 : index
    %83 = vector.load %arg7[%c416, %c0_66] : memref<512x16xbf16, #tpu.memory_space<vmem>>, vector<32x16xbf16>
    %c224_67 = arith.constant 224 : index
    %c0_68 = arith.constant 0 : index
    %84 = vector.load %arg4[%c224_67, %c0_68] : memref<784x32xbf16, #tpu.memory_space<vmem>>, vector<16x32xbf16>
    %cst_69 = arith.constant dense<0.000000e+00> : vector<32x32xf32>
    %85 = tpu.matmul %83, %84, %cst_69 {dimension_numbers = #tpu.dot_dimension_numbers<[1], [0], [0], [1], [0, 0, 1, 1], [], []>} : vector<32x16xbf16>, vector<16x32xbf16>, vector<32x32xf32> -> vector<32x32xf32>
    %86 = arith.addf %82, %85 : vector<32x32xf32>
    %c448 = arith.constant 448 : index
    %c0_70 = arith.constant 0 : index
    %87 = vector.load %arg7[%c448, %c0_70] : memref<512x16xbf16, #tpu.memory_space<vmem>>, vector<32x16xbf16>
    %c240 = arith.constant 240 : index
    %c0_71 = arith.constant 0 : index
    %88 = vector.load %arg4[%c240, %c0_71] : memref<784x32xbf16, #tpu.memory_space<vmem>>, vector<16x32xbf16>
    %cst_72 = arith.constant dense<0.000000e+00> : vector<32x32xf32>
    %89 = tpu.matmul %87, %88, %cst_72 {dimension_numbers = #tpu.dot_dimension_numbers<[1], [0], [0], [1], [0, 0, 1, 1], [], []>} : vector<32x16xbf16>, vector<16x32xbf16>, vector<32x32xf32> -> vector<32x32xf32>
    %90 = arith.addf %86, %89 : vector<32x32xf32>
    %c480 = arith.constant 480 : index
    %c0_73 = arith.constant 0 : index
    %91 = vector.load %arg7[%c480, %c0_73] : memref<512x16xbf16, #tpu.memory_space<vmem>>, vector<32x16xbf16>
    %c256_74 = arith.constant 256 : index
    %c0_75 = arith.constant 0 : index
    %92 = vector.load %arg4[%c256_74, %c0_75] : memref<784x32xbf16, #tpu.memory_space<vmem>>, vector<16x32xbf16>
    %cst_76 = arith.constant dense<0.000000e+00> : vector<32x32xf32>
    %93 = tpu.matmul %91, %92, %cst_76 {dimension_numbers = #tpu.dot_dimension_numbers<[1], [0], [0], [1], [0, 0, 1, 1], [], []>} : vector<32x16xbf16>, vector<16x32xbf16>, vector<32x32xf32> -> vector<32x32xf32>
    %94 = arith.addf %90, %93 : vector<32x32xf32>
    %95 = vector.broadcast %3 : vector<1x32xf32> to vector<32x32xf32>
    %96 = arith.addf %94, %95 : vector<32x32xf32>
    %cst_77 = arith.constant dense<0.000000e+00> : vector<32xf32>
    %97 = vector.multi_reduction <add>, %96, %cst_77 [0] : vector<32x32xf32> to vector<32xf32>
    %98 = vector.shape_cast %97 : vector<32xf32> to vector<1x32xf32>
    %cst_78 = arith.constant 3.200000e+01 : f32
    %99 = vector.broadcast %cst_78 : f32 to vector<1x32xf32>
    %100 = arith.divf %98, %99 : vector<1x32xf32>
    %101 = vector.broadcast %100 : vector<1x32xf32> to vector<32x32xf32>
    %102 = arith.subf %96, %101 : vector<32x32xf32>
    %103 = arith.mulf %102, %102 : vector<32x32xf32>
    %cst_79 = arith.constant dense<0.000000e+00> : vector<32xf32>
    %104 = vector.multi_reduction <add>, %103, %cst_79 [0] : vector<32x32xf32> to vector<32xf32>
    %105 = vector.shape_cast %104 : vector<32xf32> to vector<1x32xf32>
    %cst_80 = arith.constant 3.200000e+01 : f32
    %106 = vector.broadcast %cst_80 : f32 to vector<1x32xf32>
    %107 = arith.divf %105, %106 : vector<1x32xf32>
    %108 = vector.broadcast %100 : vector<1x32xf32> to vector<32x32xf32>
    %109 = arith.subf %96, %108 : vector<32x32xf32>
    %cst_81 = arith.constant 9.99999974E-6 : f32
    %110 = vector.broadcast %cst_81 : f32 to vector<1x32xf32>
    %111 = arith.addf %107, %110 : vector<1x32xf32>
    %112 = math.rsqrt %111 : vector<1x32xf32>
    %113 = vector.broadcast %112 : vector<1x32xf32> to vector<32x32xf32>
    %114 = arith.mulf %109, %113 : vector<32x32xf32>
    %cst_82 = arith.constant 0.000000e+00 : f32
    %115 = vector.broadcast %cst_82 : f32 to vector<32x32xf32>
    %116 = arith.cmpf ogt, %114, %115 : vector<32x32xf32>
    %cst_83 = arith.constant 2.000000e-01 : f32
    %117 = vector.broadcast %cst_83 : f32 to vector<32x32xf32>
    %118 = arith.mulf %117, %114 : vector<32x32xf32>
    %119 = arith.select %116, %114, %118 : vector<32x32xi1>, vector<32x32xf32>
    %120 = arith.truncf %119 : vector<32x32xf32> to vector<32x32xbf16>
    %cst_84 = arith.constant 0.000000e+00 : f32
    %121 = vector.broadcast %cst_84 : f32 to vector<2x12xf32>
    %122 = vector.extract_strided_slice %120 {offsets = [0, 0], sizes = [2, 32], strides = [1, 1]} : vector<32x32xbf16> to vector<2x32xbf16>
    %c272 = arith.constant 272 : index
    %c0_85 = arith.constant 0 : index
    %123 = vector.load %arg4[%c272, %c0_85] : memref<784x32xbf16, #tpu.memory_space<vmem>>, vector<32x32xbf16>
    %124 = vector.extract_strided_slice %123 {offsets = [0, 0], sizes = [32, 12], strides = [1, 1]} : vector<32x32xbf16> to vector<32x12xbf16>
    %cst_86 = arith.constant dense<0.000000e+00> : vector<2x12xf32>
    %125 = tpu.matmul %122, %124, %cst_86 {dimension_numbers = #tpu.dot_dimension_numbers<[1], [0], [0], [1], [0, 0, 1, 1], [], []>} : vector<2x32xbf16>, vector<32x12xbf16>, vector<2x12xf32> -> vector<2x12xf32>
    %126 = arith.addf %121, %125 : vector<2x12xf32>
    %127 = vector.extract_strided_slice %120 {offsets = [2, 0], sizes = [2, 32], strides = [1, 1]} : vector<32x32xbf16> to vector<2x32xbf16>
    %c304 = arith.constant 304 : index
    %c0_87 = arith.constant 0 : index
    %128 = vector.load %arg4[%c304, %c0_87] : memref<784x32xbf16, #tpu.memory_space<vmem>>, vector<32x32xbf16>
    %129 = vector.extract_strided_slice %128 {offsets = [0, 0], sizes = [32, 12], strides = [1, 1]} : vector<32x32xbf16> to vector<32x12xbf16>
    %cst_88 = arith.constant dense<0.000000e+00> : vector<2x12xf32>
    %130 = tpu.matmul %127, %129, %cst_88 {dimension_numbers = #tpu.dot_dimension_numbers<[1], [0], [0], [1], [0, 0, 1, 1], [], []>} : vector<2x32xbf16>, vector<32x12xbf16>, vector<2x12xf32> -> vector<2x12xf32>
    %131 = arith.addf %126, %130 : vector<2x12xf32>
    %132 = vector.extract_strided_slice %120 {offsets = [4, 0], sizes = [2, 32], strides = [1, 1]} : vector<32x32xbf16> to vector<2x32xbf16>
    %c336 = arith.constant 336 : index
    %c0_89 = arith.constant 0 : index
    %133 = vector.load %arg4[%c336, %c0_89] : memref<784x32xbf16, #tpu.memory_space<vmem>>, vector<32x32xbf16>
    %134 = vector.extract_strided_slice %133 {offsets = [0, 0], sizes = [32, 12], strides = [1, 1]} : vector<32x32xbf16> to vector<32x12xbf16>
    %cst_90 = arith.constant dense<0.000000e+00> : vector<2x12xf32>
    %135 = tpu.matmul %132, %134, %cst_90 {dimension_numbers = #tpu.dot_dimension_numbers<[1], [0], [0], [1], [0, 0, 1, 1], [], []>} : vector<2x32xbf16>, vector<32x12xbf16>, vector<2x12xf32> -> vector<2x12xf32>
    %136 = arith.addf %131, %135 : vector<2x12xf32>
    %137 = vector.extract_strided_slice %120 {offsets = [6, 0], sizes = [2, 32], strides = [1, 1]} : vector<32x32xbf16> to vector<2x32xbf16>
    %c368 = arith.constant 368 : index
    %c0_91 = arith.constant 0 : index
    %138 = vector.load %arg4[%c368, %c0_91] : memref<784x32xbf16, #tpu.memory_space<vmem>>, vector<32x32xbf16>
    %139 = vector.extract_strided_slice %138 {offsets = [0, 0], sizes = [32, 12], strides = [1, 1]} : vector<32x32xbf16> to vector<32x12xbf16>
    %cst_92 = arith.constant dense<0.000000e+00> : vector<2x12xf32>
    %140 = tpu.matmul %137, %139, %cst_92 {dimension_numbers = #tpu.dot_dimension_numbers<[1], [0], [0], [1], [0, 0, 1, 1], [], []>} : vector<2x32xbf16>, vector<32x12xbf16>, vector<2x12xf32> -> vector<2x12xf32>
    %141 = arith.addf %136, %140 : vector<2x12xf32>
    %142 = vector.extract_strided_slice %120 {offsets = [8, 0], sizes = [2, 32], strides = [1, 1]} : vector<32x32xbf16> to vector<2x32xbf16>
    %c400 = arith.constant 400 : index
    %c0_93 = arith.constant 0 : index
    %143 = vector.load %arg4[%c400, %c0_93] : memref<784x32xbf16, #tpu.memory_space<vmem>>, vector<32x32xbf16>
    %144 = vector.extract_strided_slice %143 {offsets = [0, 0], sizes = [32, 12], strides = [1, 1]} : vector<32x32xbf16> to vector<32x12xbf16>
    %cst_94 = arith.constant dense<0.000000e+00> : vector<2x12xf32>
    %145 = tpu.matmul %142, %144, %cst_94 {dimension_numbers = #tpu.dot_dimension_numbers<[1], [0], [0], [1], [0, 0, 1, 1], [], []>} : vector<2x32xbf16>, vector<32x12xbf16>, vector<2x12xf32> -> vector<2x12xf32>
    %146 = arith.addf %141, %145 : vector<2x12xf32>
    %147 = vector.extract_strided_slice %120 {offsets = [10, 0], sizes = [2, 32], strides = [1, 1]} : vector<32x32xbf16> to vector<2x32xbf16>
    %c432 = arith.constant 432 : index
    %c0_95 = arith.constant 0 : index
    %148 = vector.load %arg4[%c432, %c0_95] : memref<784x32xbf16, #tpu.memory_space<vmem>>, vector<32x32xbf16>
    %149 = vector.extract_strided_slice %148 {offsets = [0, 0], sizes = [32, 12], strides = [1, 1]} : vector<32x32xbf16> to vector<32x12xbf16>
    %cst_96 = arith.constant dense<0.000000e+00> : vector<2x12xf32>
    %150 = tpu.matmul %147, %149, %cst_96 {dimension_numbers = #tpu.dot_dimension_numbers<[1], [0], [0], [1], [0, 0, 1, 1], [], []>} : vector<2x32xbf16>, vector<32x12xbf16>, vector<2x12xf32> -> vector<2x12xf32>
    %151 = arith.addf %146, %150 : vector<2x12xf32>
    %152 = vector.extract_strided_slice %120 {offsets = [12, 0], sizes = [2, 32], strides = [1, 1]} : vector<32x32xbf16> to vector<2x32xbf16>
    %c464 = arith.constant 464 : index
    %c0_97 = arith.constant 0 : index
    %153 = vector.load %arg4[%c464, %c0_97] : memref<784x32xbf16, #tpu.memory_space<vmem>>, vector<32x32xbf16>
    %154 = vector.extract_strided_slice %153 {offsets = [0, 0], sizes = [32, 12], strides = [1, 1]} : vector<32x32xbf16> to vector<32x12xbf16>
    %cst_98 = arith.constant dense<0.000000e+00> : vector<2x12xf32>
    %155 = tpu.matmul %152, %154, %cst_98 {dimension_numbers = #tpu.dot_dimension_numbers<[1], [0], [0], [1], [0, 0, 1, 1], [], []>} : vector<2x32xbf16>, vector<32x12xbf16>, vector<2x12xf32> -> vector<2x12xf32>
    %156 = arith.addf %151, %155 : vector<2x12xf32>
    %157 = vector.extract_strided_slice %120 {offsets = [14, 0], sizes = [2, 32], strides = [1, 1]} : vector<32x32xbf16> to vector<2x32xbf16>
    %c496 = arith.constant 496 : index
    %c0_99 = arith.constant 0 : index
    %158 = vector.load %arg4[%c496, %c0_99] : memref<784x32xbf16, #tpu.memory_space<vmem>>, vector<32x32xbf16>
    %159 = vector.extract_strided_slice %158 {offsets = [0, 0], sizes = [32, 12], strides = [1, 1]} : vector<32x32xbf16> to vector<32x12xbf16>
    %cst_100 = arith.constant dense<0.000000e+00> : vector<2x12xf32>
    %160 = tpu.matmul %157, %159, %cst_100 {dimension_numbers = #tpu.dot_dimension_numbers<[1], [0], [0], [1], [0, 0, 1, 1], [], []>} : vector<2x32xbf16>, vector<32x12xbf16>, vector<2x12xf32> -> vector<2x12xf32>
    %161 = arith.addf %156, %160 : vector<2x12xf32>
    %162 = vector.extract_strided_slice %120 {offsets = [16, 0], sizes = [2, 32], strides = [1, 1]} : vector<32x32xbf16> to vector<2x32xbf16>
    %c528 = arith.constant 528 : index
    %c0_101 = arith.constant 0 : index
    %163 = vector.load %arg4[%c528, %c0_101] : memref<784x32xbf16, #tpu.memory_space<vmem>>, vector<32x32xbf16>
    %164 = vector.extract_strided_slice %163 {offsets = [0, 0], sizes = [32, 12], strides = [1, 1]} : vector<32x32xbf16> to vector<32x12xbf16>
    %cst_102 = arith.constant dense<0.000000e+00> : vector<2x12xf32>
    %165 = tpu.matmul %162, %164, %cst_102 {dimension_numbers = #tpu.dot_dimension_numbers<[1], [0], [0], [1], [0, 0, 1, 1], [], []>} : vector<2x32xbf16>, vector<32x12xbf16>, vector<2x12xf32> -> vector<2x12xf32>
    %166 = arith.addf %161, %165 : vector<2x12xf32>
    %167 = vector.extract_strided_slice %120 {offsets = [18, 0], sizes = [2, 32], strides = [1, 1]} : vector<32x32xbf16> to vector<2x32xbf16>
    %c560 = arith.constant 560 : index
    %c0_103 = arith.constant 0 : index
    %168 = vector.load %arg4[%c560, %c0_103] : memref<784x32xbf16, #tpu.memory_space<vmem>>, vector<32x32xbf16>
    %169 = vector.extract_strided_slice %168 {offsets = [0, 0], sizes = [32, 12], strides = [1, 1]} : vector<32x32xbf16> to vector<32x12xbf16>
    %cst_104 = arith.constant dense<0.000000e+00> : vector<2x12xf32>
    %170 = tpu.matmul %167, %169, %cst_104 {dimension_numbers = #tpu.dot_dimension_numbers<[1], [0], [0], [1], [0, 0, 1, 1], [], []>} : vector<2x32xbf16>, vector<32x12xbf16>, vector<2x12xf32> -> vector<2x12xf32>
    %171 = arith.addf %166, %170 : vector<2x12xf32>
    %172 = vector.extract_strided_slice %120 {offsets = [20, 0], sizes = [2, 32], strides = [1, 1]} : vector<32x32xbf16> to vector<2x32xbf16>
    %c592 = arith.constant 592 : index
    %c0_105 = arith.constant 0 : index
    %173 = vector.load %arg4[%c592, %c0_105] : memref<784x32xbf16, #tpu.memory_space<vmem>>, vector<32x32xbf16>
    %174 = vector.extract_strided_slice %173 {offsets = [0, 0], sizes = [32, 12], strides = [1, 1]} : vector<32x32xbf16> to vector<32x12xbf16>
    %cst_106 = arith.constant dense<0.000000e+00> : vector<2x12xf32>
    %175 = tpu.matmul %172, %174, %cst_106 {dimension_numbers = #tpu.dot_dimension_numbers<[1], [0], [0], [1], [0, 0, 1, 1], [], []>} : vector<2x32xbf16>, vector<32x12xbf16>, vector<2x12xf32> -> vector<2x12xf32>
    %176 = arith.addf %171, %175 : vector<2x12xf32>
    %177 = vector.extract_strided_slice %120 {offsets = [22, 0], sizes = [2, 32], strides = [1, 1]} : vector<32x32xbf16> to vector<2x32xbf16>
    %c624 = arith.constant 624 : index
    %c0_107 = arith.constant 0 : index
    %178 = vector.load %arg4[%c624, %c0_107] : memref<784x32xbf16, #tpu.memory_space<vmem>>, vector<32x32xbf16>
    %179 = vector.extract_strided_slice %178 {offsets = [0, 0], sizes = [32, 12], strides = [1, 1]} : vector<32x32xbf16> to vector<32x12xbf16>
    %cst_108 = arith.constant dense<0.000000e+00> : vector<2x12xf32>
    %180 = tpu.matmul %177, %179, %cst_108 {dimension_numbers = #tpu.dot_dimension_numbers<[1], [0], [0], [1], [0, 0, 1, 1], [], []>} : vector<2x32xbf16>, vector<32x12xbf16>, vector<2x12xf32> -> vector<2x12xf32>
    %181 = arith.addf %176, %180 : vector<2x12xf32>
    %182 = vector.extract_strided_slice %120 {offsets = [24, 0], sizes = [2, 32], strides = [1, 1]} : vector<32x32xbf16> to vector<2x32xbf16>
    %c656 = arith.constant 656 : index
    %c0_109 = arith.constant 0 : index
    %183 = vector.load %arg4[%c656, %c0_109] : memref<784x32xbf16, #tpu.memory_space<vmem>>, vector<32x32xbf16>
    %184 = vector.extract_strided_slice %183 {offsets = [0, 0], sizes = [32, 12], strides = [1, 1]} : vector<32x32xbf16> to vector<32x12xbf16>
    %cst_110 = arith.constant dense<0.000000e+00> : vector<2x12xf32>
    %185 = tpu.matmul %182, %184, %cst_110 {dimension_numbers = #tpu.dot_dimension_numbers<[1], [0], [0], [1], [0, 0, 1, 1], [], []>} : vector<2x32xbf16>, vector<32x12xbf16>, vector<2x12xf32> -> vector<2x12xf32>
    %186 = arith.addf %181, %185 : vector<2x12xf32>
    %187 = vector.extract_strided_slice %120 {offsets = [26, 0], sizes = [2, 32], strides = [1, 1]} : vector<32x32xbf16> to vector<2x32xbf16>
    %c688 = arith.constant 688 : index
    %c0_111 = arith.constant 0 : index
    %188 = vector.load %arg4[%c688, %c0_111] : memref<784x32xbf16, #tpu.memory_space<vmem>>, vector<32x32xbf16>
    %189 = vector.extract_strided_slice %188 {offsets = [0, 0], sizes = [32, 12], strides = [1, 1]} : vector<32x32xbf16> to vector<32x12xbf16>
    %cst_112 = arith.constant dense<0.000000e+00> : vector<2x12xf32>
    %190 = tpu.matmul %187, %189, %cst_112 {dimension_numbers = #tpu.dot_dimension_numbers<[1], [0], [0], [1], [0, 0, 1, 1], [], []>} : vector<2x32xbf16>, vector<32x12xbf16>, vector<2x12xf32> -> vector<2x12xf32>
    %191 = arith.addf %186, %190 : vector<2x12xf32>
    %192 = vector.extract_strided_slice %120 {offsets = [28, 0], sizes = [2, 32], strides = [1, 1]} : vector<32x32xbf16> to vector<2x32xbf16>
    %c720 = arith.constant 720 : index
    %c0_113 = arith.constant 0 : index
    %193 = vector.load %arg4[%c720, %c0_113] : memref<784x32xbf16, #tpu.memory_space<vmem>>, vector<32x32xbf16>
    %194 = vector.extract_strided_slice %193 {offsets = [0, 0], sizes = [32, 12], strides = [1, 1]} : vector<32x32xbf16> to vector<32x12xbf16>
    %cst_114 = arith.constant dense<0.000000e+00> : vector<2x12xf32>
    %195 = tpu.matmul %192, %194, %cst_114 {dimension_numbers = #tpu.dot_dimension_numbers<[1], [0], [0], [1], [0, 0, 1, 1], [], []>} : vector<2x32xbf16>, vector<32x12xbf16>, vector<2x12xf32> -> vector<2x12xf32>
    %196 = arith.addf %191, %195 : vector<2x12xf32>
    %197 = vector.extract_strided_slice %120 {offsets = [30, 0], sizes = [2, 32], strides = [1, 1]} : vector<32x32xbf16> to vector<2x32xbf16>
    %c752 = arith.constant 752 : index
    %c0_115 = arith.constant 0 : index
    %198 = vector.load %arg4[%c752, %c0_115] : memref<784x32xbf16, #tpu.memory_space<vmem>>, vector<32x32xbf16>
    %199 = vector.extract_strided_slice %198 {offsets = [0, 0], sizes = [32, 12], strides = [1, 1]} : vector<32x32xbf16> to vector<32x12xbf16>
    %cst_116 = arith.constant dense<0.000000e+00> : vector<2x12xf32>
    %200 = tpu.matmul %197, %199, %cst_116 {dimension_numbers = #tpu.dot_dimension_numbers<[1], [0], [0], [1], [0, 0, 1, 1], [], []>} : vector<2x32xbf16>, vector<32x12xbf16>, vector<2x12xf32> -> vector<2x12xf32>
    %201 = arith.addf %196, %200 : vector<2x12xf32>
    %202 = vector.broadcast %5 : vector<1x12xf32> to vector<2x12xf32>
    %203 = arith.addf %201, %202 : vector<2x12xf32>
    %204 = arith.negf %203 : vector<2x12xf32>
    %205 = math.exp %204 : vector<2x12xf32>
    %cst_117 = arith.constant 1.000000e+00 : f32
    %206 = vector.broadcast %cst_117 : f32 to vector<2x12xf32>
    %207 = arith.addf %206, %205 : vector<2x12xf32>
    %208 = arith.divf %206, %207 : vector<2x12xf32>
    %c0_118 = arith.constant 0 : index
    %c0_119 = arith.constant 0 : index
    %c0_120 = arith.constant 0 : index
    %209 = vector.load %arg2[%c0_118, %c0_119, %c0_120] : memref<6x2x12xf32, #tpu.memory_space<vmem>>, vector<1x2x12xf32>
    %210 = vector.shape_cast %209 : vector<1x2x12xf32> to vector<2x12xf32>
    %211 = arith.addf %208, %210 : vector<2x12xf32>
    %cst_121 = arith.constant dense<0xFF800000> : vector<2xf32>
    %212 = vector.multi_reduction <maximumf>, %211, %cst_121 [1] : vector<2x12xf32> to vector<2xf32>
    %213 = vector.shape_cast %212 : vector<2xf32> to vector<2x1xf32>
    %214 = tpu.iota {dimensions = array<i32: 1>} : vector<2x12xi32>
    %215 = vector.broadcast %213 : vector<2x1xf32> to vector<2x12xf32>
    %216 = arith.cmpf oeq, %211, %215 : vector<2x12xf32>
    %c12_i32 = arith.constant 12 : i32
    %217 = vector.broadcast %c12_i32 : i32 to vector<2x12xi32>
    %218 = arith.select %216, %214, %217 : vector<2x12xi1>, vector<2x12xi32>
    %cst_122 = arith.constant dense<2147483647> : vector<2xi32>
    %219 = vector.multi_reduction <minsi>, %218, %cst_122 [1] : vector<2x12xi32> to vector<2xi32>
    %220 = vector.shape_cast %219 : vector<2xi32> to vector<2x1xi32>
    %221 = vector.broadcast %220 : vector<2x1xi32> to vector<2x12xi32>
    %222 = arith.cmpi eq, %214, %221 : vector<2x12xi32>
    %223 = arith.extui %222 : vector<2x12xi1> to vector<2x12xi32>
    %224 = arith.sitofp %223 : vector<2x12xi32> to vector<2x12xf32>
    %cst_123 = arith.constant dense<0.000000e+00> : vector<2x12xf32>
    %225 = tpu.matmul %224, %9, %cst_123 {dimension_numbers = #tpu.dot_dimension_numbers<[1], [0], [0], [1], [0, 0, 1, 1], [], []>} : vector<2x12xf32>, vector<12x12xf32>, vector<2x12xf32> -> vector<2x12xf32>
    %c1_124 = arith.constant 1 : index
    %c0_125 = arith.constant 0 : index
    %c0_126 = arith.constant 0 : index
    %226 = vector.load %arg2[%c1_124, %c0_125, %c0_126] : memref<6x2x12xf32, #tpu.memory_space<vmem>>, vector<1x2x12xf32>
    %227 = vector.shape_cast %226 : vector<1x2x12xf32> to vector<2x12xf32>
    %228 = arith.addf %225, %227 : vector<2x12xf32>
    %cst_127 = arith.constant dense<0xFF800000> : vector<2xf32>
    %229 = vector.multi_reduction <maximumf>, %228, %cst_127 [1] : vector<2x12xf32> to vector<2xf32>
    %230 = vector.shape_cast %229 : vector<2xf32> to vector<2x1xf32>
    %231 = tpu.iota {dimensions = array<i32: 1>} : vector<2x12xi32>
    %232 = vector.broadcast %230 : vector<2x1xf32> to vector<2x12xf32>
    %233 = arith.cmpf oeq, %228, %232 : vector<2x12xf32>
    %c12_i32_128 = arith.constant 12 : i32
    %234 = vector.broadcast %c12_i32_128 : i32 to vector<2x12xi32>
    %235 = arith.select %233, %231, %234 : vector<2x12xi1>, vector<2x12xi32>
    %cst_129 = arith.constant dense<2147483647> : vector<2xi32>
    %236 = vector.multi_reduction <minsi>, %235, %cst_129 [1] : vector<2x12xi32> to vector<2xi32>
    %237 = vector.shape_cast %236 : vector<2xi32> to vector<2x1xi32>
    %238 = vector.broadcast %237 : vector<2x1xi32> to vector<2x12xi32>
    %239 = arith.cmpi eq, %231, %238 : vector<2x12xi32>
    %240 = arith.extui %239 : vector<2x12xi1> to vector<2x12xi32>
    %241 = arith.sitofp %240 : vector<2x12xi32> to vector<2x12xf32>
    %242 = vector.extract_strided_slice %224 {offsets = [0, 11], sizes = [2, 1], strides = [1, 1]} : vector<2x12xf32> to vector<2x1xf32>
    %cst_130 = arith.constant 0.000000e+00 : f32
    %243 = vector.broadcast %cst_130 : f32 to vector<2x1xf32>
    %244 = arith.cmpf one, %242, %243 : vector<2x1xf32>
    %245 = vector.shape_cast %244 : vector<2x1xi1> to vector<2x1xi1>
    %246 = vector.broadcast %245 : vector<2x1xi1> to vector<2x12xi1>
    %247 = arith.select %246, %224, %241 : vector<2x12xi1>, vector<2x12xf32>
    %cst_131 = arith.constant dense<0.000000e+00> : vector<2x12xf32>
    %248 = tpu.matmul %247, %9, %cst_131 {dimension_numbers = #tpu.dot_dimension_numbers<[1], [0], [0], [1], [0, 0, 1, 1], [], []>} : vector<2x12xf32>, vector<12x12xf32>, vector<2x12xf32> -> vector<2x12xf32>
    %c2_132 = arith.constant 2 : index
    %c0_133 = arith.constant 0 : index
    %c0_134 = arith.constant 0 : index
    %249 = vector.load %arg2[%c2_132, %c0_133, %c0_134] : memref<6x2x12xf32, #tpu.memory_space<vmem>>, vector<1x2x12xf32>
    %250 = vector.shape_cast %249 : vector<1x2x12xf32> to vector<2x12xf32>
    %251 = arith.addf %248, %250 : vector<2x12xf32>
    %cst_135 = arith.constant dense<0xFF800000> : vector<2xf32>
    %252 = vector.multi_reduction <maximumf>, %251, %cst_135 [1] : vector<2x12xf32> to vector<2xf32>
    %253 = vector.shape_cast %252 : vector<2xf32> to vector<2x1xf32>
    %254 = tpu.iota {dimensions = array<i32: 1>} : vector<2x12xi32>
    %255 = vector.broadcast %253 : vector<2x1xf32> to vector<2x12xf32>
    %256 = arith.cmpf oeq, %251, %255 : vector<2x12xf32>
    %c12_i32_136 = arith.constant 12 : i32
    %257 = vector.broadcast %c12_i32_136 : i32 to vector<2x12xi32>
    %258 = arith.select %256, %254, %257 : vector<2x12xi1>, vector<2x12xi32>
    %cst_137 = arith.constant dense<2147483647> : vector<2xi32>
    %259 = vector.multi_reduction <minsi>, %258, %cst_137 [1] : vector<2x12xi32> to vector<2xi32>
    %260 = vector.shape_cast %259 : vector<2xi32> to vector<2x1xi32>
    %261 = vector.broadcast %260 : vector<2x1xi32> to vector<2x12xi32>
    %262 = arith.cmpi eq, %254, %261 : vector<2x12xi32>
    %263 = arith.extui %262 : vector<2x12xi1> to vector<2x12xi32>
    %264 = arith.sitofp %263 : vector<2x12xi32> to vector<2x12xf32>
    %265 = vector.extract_strided_slice %247 {offsets = [0, 11], sizes = [2, 1], strides = [1, 1]} : vector<2x12xf32> to vector<2x1xf32>
    %cst_138 = arith.constant 0.000000e+00 : f32
    %266 = vector.broadcast %cst_138 : f32 to vector<2x1xf32>
    %267 = arith.cmpf one, %265, %266 : vector<2x1xf32>
    %268 = vector.shape_cast %267 : vector<2x1xi1> to vector<2x1xi1>
    %269 = vector.broadcast %268 : vector<2x1xi1> to vector<2x12xi1>
    %270 = arith.select %269, %247, %264 : vector<2x12xi1>, vector<2x12xf32>
    %cst_139 = arith.constant dense<0.000000e+00> : vector<2x12xf32>
    %271 = tpu.matmul %270, %9, %cst_139 {dimension_numbers = #tpu.dot_dimension_numbers<[1], [0], [0], [1], [0, 0, 1, 1], [], []>} : vector<2x12xf32>, vector<12x12xf32>, vector<2x12xf32> -> vector<2x12xf32>
    %c3_140 = arith.constant 3 : index
    %c0_141 = arith.constant 0 : index
    %c0_142 = arith.constant 0 : index
    %272 = vector.load %arg2[%c3_140, %c0_141, %c0_142] : memref<6x2x12xf32, #tpu.memory_space<vmem>>, vector<1x2x12xf32>
    %273 = vector.shape_cast %272 : vector<1x2x12xf32> to vector<2x12xf32>
    %274 = arith.addf %271, %273 : vector<2x12xf32>
    %cst_143 = arith.constant dense<0xFF800000> : vector<2xf32>
    %275 = vector.multi_reduction <maximumf>, %274, %cst_143 [1] : vector<2x12xf32> to vector<2xf32>
    %276 = vector.shape_cast %275 : vector<2xf32> to vector<2x1xf32>
    %277 = tpu.iota {dimensions = array<i32: 1>} : vector<2x12xi32>
    %278 = vector.broadcast %276 : vector<2x1xf32> to vector<2x12xf32>
    %279 = arith.cmpf oeq, %274, %278 : vector<2x12xf32>
    %c12_i32_144 = arith.constant 12 : i32
    %280 = vector.broadcast %c12_i32_144 : i32 to vector<2x12xi32>
    %281 = arith.select %279, %277, %280 : vector<2x12xi1>, vector<2x12xi32>
    %cst_145 = arith.constant dense<2147483647> : vector<2xi32>
    %282 = vector.multi_reduction <minsi>, %281, %cst_145 [1] : vector<2x12xi32> to vector<2xi32>
    %283 = vector.shape_cast %282 : vector<2xi32> to vector<2x1xi32>
    %284 = vector.broadcast %283 : vector<2x1xi32> to vector<2x12xi32>
    %285 = arith.cmpi eq, %277, %284 : vector<2x12xi32>
    %286 = arith.extui %285 : vector<2x12xi1> to vector<2x12xi32>
    %287 = arith.sitofp %286 : vector<2x12xi32> to vector<2x12xf32>
    %288 = vector.extract_strided_slice %270 {offsets = [0, 11], sizes = [2, 1], strides = [1, 1]} : vector<2x12xf32> to vector<2x1xf32>
    %cst_146 = arith.constant 0.000000e+00 : f32
    %289 = vector.broadcast %cst_146 : f32 to vector<2x1xf32>
    %290 = arith.cmpf one, %288, %289 : vector<2x1xf32>
    %291 = vector.shape_cast %290 : vector<2x1xi1> to vector<2x1xi1>
    %292 = vector.broadcast %291 : vector<2x1xi1> to vector<2x12xi1>
    %293 = arith.select %292, %270, %287 : vector<2x12xi1>, vector<2x12xf32>
    %cst_147 = arith.constant dense<0.000000e+00> : vector<2x12xf32>
    %294 = tpu.matmul %293, %9, %cst_147 {dimension_numbers = #tpu.dot_dimension_numbers<[1], [0], [0], [1], [0, 0, 1, 1], [], []>} : vector<2x12xf32>, vector<12x12xf32>, vector<2x12xf32> -> vector<2x12xf32>
    %c4 = arith.constant 4 : index
    %c0_148 = arith.constant 0 : index
    %c0_149 = arith.constant 0 : index
    %295 = vector.load %arg2[%c4, %c0_148, %c0_149] : memref<6x2x12xf32, #tpu.memory_space<vmem>>, vector<1x2x12xf32>
    %296 = vector.shape_cast %295 : vector<1x2x12xf32> to vector<2x12xf32>
    %297 = arith.addf %294, %296 : vector<2x12xf32>
    %cst_150 = arith.constant dense<0xFF800000> : vector<2xf32>
    %298 = vector.multi_reduction <maximumf>, %297, %cst_150 [1] : vector<2x12xf32> to vector<2xf32>
    %299 = vector.shape_cast %298 : vector<2xf32> to vector<2x1xf32>
    %300 = tpu.iota {dimensions = array<i32: 1>} : vector<2x12xi32>
    %301 = vector.broadcast %299 : vector<2x1xf32> to vector<2x12xf32>
    %302 = arith.cmpf oeq, %297, %301 : vector<2x12xf32>
    %c12_i32_151 = arith.constant 12 : i32
    %303 = vector.broadcast %c12_i32_151 : i32 to vector<2x12xi32>
    %304 = arith.select %302, %300, %303 : vector<2x12xi1>, vector<2x12xi32>
    %cst_152 = arith.constant dense<2147483647> : vector<2xi32>
    %305 = vector.multi_reduction <minsi>, %304, %cst_152 [1] : vector<2x12xi32> to vector<2xi32>
    %306 = vector.shape_cast %305 : vector<2xi32> to vector<2x1xi32>
    %307 = vector.broadcast %306 : vector<2x1xi32> to vector<2x12xi32>
    %308 = arith.cmpi eq, %300, %307 : vector<2x12xi32>
    %309 = arith.extui %308 : vector<2x12xi1> to vector<2x12xi32>
    %310 = arith.sitofp %309 : vector<2x12xi32> to vector<2x12xf32>
    %311 = vector.extract_strided_slice %293 {offsets = [0, 11], sizes = [2, 1], strides = [1, 1]} : vector<2x12xf32> to vector<2x1xf32>
    %cst_153 = arith.constant 0.000000e+00 : f32
    %312 = vector.broadcast %cst_153 : f32 to vector<2x1xf32>
    %313 = arith.cmpf one, %311, %312 : vector<2x1xf32>
    %314 = vector.shape_cast %313 : vector<2x1xi1> to vector<2x1xi1>
    %315 = vector.broadcast %314 : vector<2x1xi1> to vector<2x12xi1>
    %316 = arith.select %315, %293, %310 : vector<2x12xi1>, vector<2x12xf32>
    %cst_154 = arith.constant dense<0.000000e+00> : vector<2x12xf32>
    %317 = tpu.matmul %316, %9, %cst_154 {dimension_numbers = #tpu.dot_dimension_numbers<[1], [0], [0], [1], [0, 0, 1, 1], [], []>} : vector<2x12xf32>, vector<12x12xf32>, vector<2x12xf32> -> vector<2x12xf32>
    %c5 = arith.constant 5 : index
    %c0_155 = arith.constant 0 : index
    %c0_156 = arith.constant 0 : index
    %318 = vector.load %arg2[%c5, %c0_155, %c0_156] : memref<6x2x12xf32, #tpu.memory_space<vmem>>, vector<1x2x12xf32>
    %319 = vector.shape_cast %318 : vector<1x2x12xf32> to vector<2x12xf32>
    %320 = arith.addf %317, %319 : vector<2x12xf32>
    %cst_157 = arith.constant dense<0xFF800000> : vector<2xf32>
    %321 = vector.multi_reduction <maximumf>, %320, %cst_157 [1] : vector<2x12xf32> to vector<2xf32>
    %322 = vector.shape_cast %321 : vector<2xf32> to vector<2x1xf32>
    %323 = tpu.iota {dimensions = array<i32: 1>} : vector<2x12xi32>
    %324 = vector.broadcast %322 : vector<2x1xf32> to vector<2x12xf32>
    %325 = arith.cmpf oeq, %320, %324 : vector<2x12xf32>
    %c12_i32_158 = arith.constant 12 : i32
    %326 = vector.broadcast %c12_i32_158 : i32 to vector<2x12xi32>
    %327 = arith.select %325, %323, %326 : vector<2x12xi1>, vector<2x12xi32>
    %cst_159 = arith.constant dense<2147483647> : vector<2xi32>
    %328 = vector.multi_reduction <minsi>, %327, %cst_159 [1] : vector<2x12xi32> to vector<2xi32>
    %329 = vector.shape_cast %328 : vector<2xi32> to vector<2x1xi32>
    %330 = vector.broadcast %329 : vector<2x1xi32> to vector<2x12xi32>
    %331 = arith.cmpi eq, %323, %330 : vector<2x12xi32>
    %332 = arith.extui %331 : vector<2x12xi1> to vector<2x12xi32>
    %333 = arith.sitofp %332 : vector<2x12xi32> to vector<2x12xf32>
    %334 = vector.extract_strided_slice %316 {offsets = [0, 11], sizes = [2, 1], strides = [1, 1]} : vector<2x12xf32> to vector<2x1xf32>
    %cst_160 = arith.constant 0.000000e+00 : f32
    %335 = vector.broadcast %cst_160 : f32 to vector<2x1xf32>
    %336 = arith.cmpf one, %334, %335 : vector<2x1xf32>
    %337 = vector.shape_cast %336 : vector<2x1xi1> to vector<2x1xi1>
    %338 = vector.broadcast %337 : vector<2x1xi1> to vector<2x12xi1>
    %339 = arith.select %338, %316, %333 : vector<2x12xi1>, vector<2x12xf32>
    %cst_161 = arith.constant dense<0.000000e+00> : vector<2x128xf32>
    %340 = tpu.matmul %339, %10, %cst_161 {dimension_numbers = #tpu.dot_dimension_numbers<[1], [0], [0], [1], [0, 0, 1, 1], [], []>} : vector<2x12xf32>, vector<12x128xf32>, vector<2x128xf32> -> vector<2x128xf32>
    %cst_162 = arith.constant 0.000000e+00 : f32
    %341 = vector.broadcast %cst_162 : f32 to vector<1x32xf32>
    %cst_163 = arith.constant 0.000000e+00 : f32
    %342 = vector.broadcast %cst_163 : f32 to vector<1x32xf32>
    %343 = vector.extract_strided_slice %340 {offsets = [0, 0], sizes = [1, 128], strides = [1, 1]} : vector<2x128xf32> to vector<1x128xf32>
    %cst_164 = arith.constant dense<0.000000e+00> : vector<1x128xf32>
    %344 = tpu.matmul %341, %11, %cst_164 {dimension_numbers = #tpu.dot_dimension_numbers<[1], [0], [0], [1], [0, 0, 1, 1], [], []>} : vector<1x32xf32>, vector<32x128xf32>, vector<1x128xf32> -> vector<1x128xf32>
    %345 = arith.addf %343, %344 : vector<1x128xf32>
    %346 = vector.extract_strided_slice %345 {offsets = [0, 0], sizes = [1, 32], strides = [1, 1]} : vector<1x128xf32> to vector<1x32xf32>
    %347 = arith.negf %346 : vector<1x32xf32>
    %348 = math.exp %347 : vector<1x32xf32>
    %cst_165 = arith.constant 1.000000e+00 : f32
    %349 = vector.broadcast %cst_165 : f32 to vector<1x32xf32>
    %350 = arith.addf %349, %348 : vector<1x32xf32>
    %351 = arith.divf %349, %350 : vector<1x32xf32>
    %352 = vector.extract_strided_slice %345 {offsets = [0, 32], sizes = [1, 32], strides = [1, 1]} : vector<1x128xf32> to vector<1x32xf32>
    %353 = arith.negf %352 : vector<1x32xf32>
    %354 = math.exp %353 : vector<1x32xf32>
    %cst_166 = arith.constant 1.000000e+00 : f32
    %355 = vector.broadcast %cst_166 : f32 to vector<1x32xf32>
    %356 = arith.addf %355, %354 : vector<1x32xf32>
    %357 = arith.divf %355, %356 : vector<1x32xf32>
    %358 = vector.extract_strided_slice %345 {offsets = [0, 64], sizes = [1, 32], strides = [1, 1]} : vector<1x128xf32> to vector<1x32xf32>
    %359 = math.tanh %358 : vector<1x32xf32>
    %360 = vector.extract_strided_slice %345 {offsets = [0, 96], sizes = [1, 32], strides = [1, 1]} : vector<1x128xf32> to vector<1x32xf32>
    %361 = arith.negf %360 : vector<1x32xf32>
    %362 = math.exp %361 : vector<1x32xf32>
    %cst_167 = arith.constant 1.000000e+00 : f32
    %363 = vector.broadcast %cst_167 : f32 to vector<1x32xf32>
    %364 = arith.addf %363, %362 : vector<1x32xf32>
    %365 = arith.divf %363, %364 : vector<1x32xf32>
    %366 = arith.mulf %357, %342 : vector<1x32xf32>
    %367 = arith.mulf %351, %359 : vector<1x32xf32>
    %368 = arith.addf %366, %367 : vector<1x32xf32>
    %369 = math.tanh %368 : vector<1x32xf32>
    %370 = arith.mulf %365, %369 : vector<1x32xf32>
    %c0_168 = arith.constant 0 : index
    %c0_169 = arith.constant 0 : index
    %371 = vector.load %arg8[%c0_168, %c0_169] : memref<2x32xf32, #tpu.memory_space<vmem>>, vector<1x32xf32>
    tpu.vector_store %arg8[%c0_168, %c0_169], %370 {strides = array<i32>} : memref<2x32xf32, #tpu.memory_space<vmem>>, vector<1x32xf32>,
    %372 = vector.extract_strided_slice %340 {offsets = [1, 0], sizes = [1, 128], strides = [1, 1]} : vector<2x128xf32> to vector<1x128xf32>
    %cst_170 = arith.constant dense<0.000000e+00> : vector<1x128xf32>
    %373 = tpu.matmul %370, %11, %cst_170 {dimension_numbers = #tpu.dot_dimension_numbers<[1], [0], [0], [1], [0, 0, 1, 1], [], []>} : vector<1x32xf32>, vector<32x128xf32>, vector<1x128xf32> -> vector<1x128xf32>
    %374 = arith.addf %372, %373 : vector<1x128xf32>
    %375 = vector.extract_strided_slice %374 {offsets = [0, 0], sizes = [1, 32], strides = [1, 1]} : vector<1x128xf32> to vector<1x32xf32>
    %376 = arith.negf %375 : vector<1x32xf32>
    %377 = math.exp %376 : vector<1x32xf32>
    %cst_171 = arith.constant 1.000000e+00 : f32
    %378 = vector.broadcast %cst_171 : f32 to vector<1x32xf32>
    %379 = arith.addf %378, %377 : vector<1x32xf32>
    %380 = arith.divf %378, %379 : vector<1x32xf32>
    %381 = vector.extract_strided_slice %374 {offsets = [0, 32], sizes = [1, 32], strides = [1, 1]} : vector<1x128xf32> to vector<1x32xf32>
    %382 = arith.negf %381 : vector<1x32xf32>
    %383 = math.exp %382 : vector<1x32xf32>
    %cst_172 = arith.constant 1.000000e+00 : f32
    %384 = vector.broadcast %cst_172 : f32 to vector<1x32xf32>
    %385 = arith.addf %384, %383 : vector<1x32xf32>
    %386 = arith.divf %384, %385 : vector<1x32xf32>
    %387 = vector.extract_strided_slice %374 {offsets = [0, 64], sizes = [1, 32], strides = [1, 1]} : vector<1x128xf32> to vector<1x32xf32>
    %388 = math.tanh %387 : vector<1x32xf32>
    %389 = vector.extract_strided_slice %374 {offsets = [0, 96], sizes = [1, 32], strides = [1, 1]} : vector<1x128xf32> to vector<1x32xf32>
    %390 = arith.negf %389 : vector<1x32xf32>
    %391 = math.exp %390 : vector<1x32xf32>
    %cst_173 = arith.constant 1.000000e+00 : f32
    %392 = vector.broadcast %cst_173 : f32 to vector<1x32xf32>
    %393 = arith.addf %392, %391 : vector<1x32xf32>
    %394 = arith.divf %392, %393 : vector<1x32xf32>
    %395 = arith.mulf %386, %368 : vector<1x32xf32>
    %396 = arith.mulf %380, %388 : vector<1x32xf32>
    %397 = arith.addf %395, %396 : vector<1x32xf32>
    %398 = math.tanh %397 : vector<1x32xf32>
    %399 = arith.mulf %394, %398 : vector<1x32xf32>
    %c1_174 = arith.constant 1 : index
    %c0_175 = arith.constant 0 : index
    %400 = vector.load %arg8[%c1_174, %c0_175] : memref<2x32xf32, #tpu.memory_space<vmem>>, vector<1x32xf32>
    tpu.vector_store %arg8[%c1_174, %c0_175], %399 {strides = array<i32>} : memref<2x32xf32, #tpu.memory_space<vmem>>, vector<1x32xf32>,
    %c0_176 = arith.constant 0 : index
    %c0_177 = arith.constant 0 : index
    %401 = vector.load %arg8[%c0_176, %c0_177] : memref<2x32xf32, #tpu.memory_space<vmem>>, vector<2x32xf32>
    %cst_178 = arith.constant dense<0.000000e+00> : vector<2x10xf32>
    %402 = tpu.matmul %401, %13, %cst_178 {dimension_numbers = #tpu.dot_dimension_numbers<[1], [0], [0], [1], [0, 0, 1, 1], [], []>} : vector<2x32xf32>, vector<32x10xf32>, vector<2x10xf32> -> vector<2x10xf32>
    %403 = vector.broadcast %7 : vector<1x10xf32> to vector<2x10xf32>
    %404 = arith.addf %402, %403 : vector<2x10xf32>
    %405 = math.tanh %404 : vector<2x10xf32>
    %cst_179 = arith.constant dense<0xFF800000> : vector<2xf32>
    %406 = vector.multi_reduction <maximumf>, %405, %cst_179 [1] : vector<2x10xf32> to vector<2xf32>
    %407 = vector.shape_cast %406 : vector<2xf32> to vector<2x1xf32>
    %408 = vector.broadcast %407 : vector<2x1xf32> to vector<2x10xf32>
    %409 = arith.subf %405, %408 : vector<2x10xf32>
    %410 = math.exp %409 : vector<2x10xf32>
    %cst_180 = arith.constant dense<0.000000e+00> : vector<2xf32>
    %411 = vector.multi_reduction <add>, %410, %cst_180 [1] : vector<2x10xf32> to vector<2xf32>
    %412 = vector.shape_cast %411 : vector<2xf32> to vector<2x1xf32>
    %413 = math.log %412 : vector<2x1xf32>
    %414 = arith.addf %413, %407 : vector<2x1xf32>
    %415 = vector.broadcast %414 : vector<2x1xf32> to vector<2x10xf32>
    %416 = arith.subf %405, %415 : vector<2x10xf32>
    %c0_181 = arith.constant 0 : index
    %c0_182 = arith.constant 0 : index
    %417 = vector.load %arg6[%c0_181, %c0_182] : memref<2x10xf32, #tpu.memory_space<vmem>>, vector<2x10xf32>
    tpu.vector_store %arg6[%c0_181, %c0_182], %416 {strides = array<i32>} : memref<2x10xf32, #tpu.memory_space<vmem>>, vector<2x10xf32>,
    return
  }
  func.func @transform_0(%arg0: i32) -> (i32, i32) {
    %c0_i32 = arith.constant 0 : i32
    %c0_i32_0 = arith.constant 0 : i32
    %c0_i32_1 = arith.constant 0 : i32
    return %c0_i32, %c0_i32_0 : i32, i32
  }
  func.func @transform_1(%arg0: i32) -> (i32, i32, i32) {
    %c0_i32 = arith.constant 0 : i32
    %c0_i32_0 = arith.constant 0 : i32
    %c0_i32_1 = arith.constant 0 : i32
    %c0_i32_2 = arith.constant 0 : i32
    return %c0_i32, %c0_i32_0, %c0_i32_1 : i32, i32, i32
  }
  func.func @transform_2(%arg0: i32) -> (i32, i32) {
    %c0_i32 = arith.constant 0 : i32
    %c0_i32_0 = arith.constant 0 : i32
    %c0_i32_1 = arith.constant 0 : i32
    return %c0_i32, %c0_i32_0 : i32, i32
  }
  func.func @transform_3(%arg0: i32) -> (i32, i32) {
    %c0_i32 = arith.constant 0 : i32
    %c0_i32_0 = arith.constant 0 : i32
    %c0_i32_1 = arith.constant 0 : i32
    return %c0_i32, %c0_i32_0 : i32, i32
  }
  func.func @transform_4(%arg0: i32) -> (i32, i32) {
    %c0_i32 = arith.constant 0 : i32
    %c0_i32_0 = arith.constant 0 : i32
    %c0_i32_1 = arith.constant 0 : i32
    return %c0_i32, %c0_i32_0 : i32, i32
  }
  func.func @transform_5(%arg0: i32) -> (i32, i32) {
    %c0_i32 = arith.constant 0 : i32
    %c0_i32_0 = arith.constant 0 : i32
    %c0_i32_1 = arith.constant 0 : i32
    return %c0_i32, %c0_i32_0 : i32, i32
  }
}

</mosaic_0001>

<bundles_post_ra>
// kernel: classifier_forward.1
= control target key start
LH: loop header
LB: loop body
LE: loop exit
PB: predicated region body
PF: predicated region fallthrough
CT: control target
= control target key end

     0   :  { %vm106_vm0 = vcmask 130048   ;;  %s5693_s0 = inlined_call_operand.vmem [shape: bf16[128,16], index: 0, kind: input, shape index: {}]   ;;  %s5694_s1 = inlined_call_operand.vmem [shape: f32[6,2,12], index: 1, kind: input, shape index: {}]   ;;  %s5695_s2 = inlined_call_operand.vmem [shape: bf16[512,128], index: 2, kind: input, shape index: {}]   ;;  %s5696_s3 = inlined_call_operand.vmem [shape: bf16[784,32], index: 3, kind: input, shape index: {}]   ;;  %s5697_s4 = inlined_call_operand.vmem [shape: f32[104,128], index: 4, kind: input, shape index: {}]   ;;  %s5698_s5 = inlined_call_operand.hbm [shape: f32[2,10], index: 5, kind: output, shape index: {}]  }
   0x1   :  { %v4860_v0 = vld [vmem:[%s5696_s3] sm:$0xff]   ;;  %v4862_v2 = vld [vmem:[%s5693_s0 + $0x8] sm:$0xff]   ;;  %v4863_v3 = vld [vmem:[%s5693_s0 + $0x10] sm:$0xff]  }
   0x2   :  { %v4861_v1 = vld [vmem:[%s5693_s0] sm:$0xff]   ;;  %4350 = vmatprep.subr.bf16.mxu0 %v4860_v0  ;;  %v4864_v4 = vld [vmem:[%s5693_s0 + $0x18] sm:$0xff]   ;;  %v4866_v6 = vld [vmem:[%s5693_s0 + $0x28] sm:$0xff]  }
   0x3   :  { %4351 = vmatpush3.bf16.msra.mxu0 %v4860_v0  ;;  %4352 = vmatprep.mubr.msk.bf16.mxu0 %vm106_vm0, %v4861_v1  ;;  %v4865_v5 = vld [vmem:[%s5693_s0 + $0x20] sm:$0xff]   ;;  %v4867_v7 = vld [vmem:[%s5693_s0 + $0x30] sm:$0xff]   ;;  %v4868_v8 = vld [vmem:[%s5693_s0 + $0x38] sm:$0xff]  }
   0x6   :  { %4353 = vmatmul.mubr.msk.bf16.vlgmr.msra.gmra.mrb[0].mxu0 %vm106_vm0, %v4862_v2 }
   0x7   :  { %4356 = vmatprep.mubr.msk.bf16.mxu0 %vm106_vm0, %v4863_v3 }
   0xe   :  { %4357 = vmatmul.mubr.msk.bf16.gmra.mrb[4].mxu0 %vm106_vm0, %v4864_v4 }
   0xf   :  { %4360 = vmatprep.mubr.msk.bf16.mxu0 %vm106_vm0, %v4865_v5 }
  0x16   :  { %4361 = vmatmul.mubr.msk.bf16.gmra.mrb[8].mxu0 %vm106_vm0, %v4866_v6 }
  0x17   :  { %4364 = vmatprep.mubr.msk.bf16.mxu0 %vm106_vm0, %v4867_v7 }
  0x1e   :  { %4365 = vmatmul.mubr.msk.bf16.gmra.mrb[12].mxu0 %vm106_vm0, %v4868_v8 }
  0x1f   :  { %10 = vsyncpa [#allocation5], 0  ;;  %v4869_v9 = vld [vmem:[%s5695_s2] sm:$0xff]   ;;  %s5007_s0 = smov 64   ;;  %s5008_s15 = smov 32  }
  0x20   :  { %4384 = vmatprep.mubr.bf16.mxu1 %v4869_v9  ;;  %v5081_v10 = vld [vmem:[%s5697_s4] ss:$0 sm:$0xff] }
  0xd9   :  { %v4354_v11 = vpop.f32.mrb[0].mxu0 }
  0xda   :  { %v174_v12 = vadd.f32 %v4354_v11, %v5081_v10  ;;  %v165_v13 = vpop.f32.mrb[1].mxu0 }
  0xdb   :  { %v166_v14 = vadd.f32 %v5081_v10, %v165_v13  ;;  %v4355_v15 = vpop.f32.mrb[2].mxu0 }
  0xdc   :  { %v246_v16 = vmul.f32 0.2, %v174_v12  ;;  %v177_v17 = vadd.f32 %v4355_v15, %v5081_v10  ;;  %v168_v18 = vpop.f32.mrb[3].mxu0  ;;  %vm230_vm1 = vcmp.gt.f32.partialorder %v174_v12, 0.0 }
  0xdd   :  { %v244_v19 = vmul.f32 0.2, %v166_v14  ;;  %v169_v20 = vadd.f32 %v5081_v10, %v168_v18  ;;  %vm228_vm3 = vcmp.gt.f32.partialorder %v166_v14, 0.0 }
  0xde   :  { %vm231_vm2 = vcmp.gt.f32.partialorder %v177_v17, 0.0  ;;  %v247_v21 = vmul.f32 0.2, %v177_v17  ;;  %v262_v23 = vsel %vm230_vm1, %v174_v12, %v246_v16 }
  0xdf   :  { %v245_v22 = vmul.f32 0.2, %v169_v20  ;;  %vm229_vm4 = vcmp.gt.f32.partialorder %v169_v20, 0.0  ;;  %v260_v26 = vsel %vm228_vm3, %v166_v14, %v244_v19 }
  0xe0   :  { %v263_v24 = vsel %vm231_vm2, %v177_v17, %v247_v21  ;;  %v4871_v21 = vld [vmem:[%s5695_s2 + $0x10] sm:$0xff]   ;;  %vm1997_vm2 = vcmask 261120  }
  0xe1   :  { %v4358_v25 = vpop.f32.mrb[4].mxu0  ;;  %v261_v27 = vsel %vm229_vm4, %v169_v20, %v245_v22  ;;  %v277_v28 = vpack.c.bf16 %v263_v24, %v262_v23  ;;  %v4901_v20 = vld [vmem:[%s5696_s3 + $0x10] sm:$0xff]   ;;  %v4872_v22 = vld [vmem:[%s5695_s2 + $0x18] sm:$0xff]   ;;  %v4873_v23 = vld [vmem:[%s5695_s2 + $0x20] sm:$0xff]  }
  0xe2   :  { %v190_v29 = vadd.f32 %v4358_v25, %v5081_v10  ;;  %v181_v30 = vpop.f32.mrb[5].mxu0  ;;  %v276_v31 = vpack.c.bf16 %v261_v27, %v260_v26  ;;  %4448 = vmatprep.subr.bf16.mxu0 %v4901_v20  ;;  %v4874_v24 = vld [vmem:[%s5695_s2 + $0x28] sm:$0xff]   ;;  %v4875_v25 = vld [vmem:[%s5695_s2 + $0x30] sm:$0xff]   ;;  %v4876_v26 = vld [vmem:[%s5695_s2 + $0x38] sm:$0xff]  }
  0xe3   :  { %v182_v32 = vadd.f32 %v5081_v10, %v181_v30  ;;  %v4359_v33 = vpop.f32.mrb[6].mxu0  ;;  %4449 = vmatpush3.bf16.msra.mxu0 %v4901_v20  ;;  %v4877_v27 = vld [vmem:[%s5695_s2 + $0x40] sm:$0xff]   ;;  %v4880_v30 = vld [vmem:[%s5695_s2 + $0x58] sm:$0xff]  }
  0xe4   :  { %v250_v34 = vmul.f32 0.2, %v190_v29  ;;  %v193_v35 = vadd.f32 %v4359_v33, %v5081_v10  ;;  %v184_v36 = vpop.f32.mrb[7].mxu0  ;;  %4368 = vmatprep.subr.bf16.mxu1 %v276_v31  ;;  %vm234_vm5 = vcmp.gt.f32.partialorder %v190_v29, 0.0  ;;  %v4883_v33 = vld [vmem:[%s5695_s2 + $0x70] sm:$0xff]  }
  0xe5   :  { %v248_v37 = vmul.f32 0.2, %v182_v32  ;;  %v185_v38 = vadd.f32 %v5081_v10, %v184_v36  ;;  %4369 = vmatpush3.bf16.msra.mxu1 %v276_v31  ;;  %vm232_vm6 = vcmp.gt.f32.partialorder %v182_v32, 0.0  ;;  %v4881_v31 = vld [vmem:[%s5695_s2 + $0x60] sm:$0xff]   ;;  %v4886_v36 = vld [vmem:[%s5695_s2 + $0x88] sm:$0xff]  }
  0xe6   :  { %vm235_vm7 = vcmp.gt.f32.partialorder %v193_v35, 0.0  ;;  %v251_v39 = vmul.f32 0.2, %v193_v35  ;;  %4370 = vmatprep.subr.bf16.mxu1 %v277_v28  ;;  %v266_v41 = vsel %vm234_vm5, %v190_v29, %v250_v34  ;;  %v4879_v29 = vld [vmem:[%s5695_s2 + $0x50] sm:$0xff]   ;;  %v4884_v34 = vld [vmem:[%s5695_s2 + $0x78] sm:$0xff]  }
  0xe7   :  { %vm233_vm8 = vcmp.gt.f32.partialorder %v185_v38, 0.0  ;;  %v249_v40 = vmul.f32 0.2, %v185_v38  ;;  %v264_v44 = vsel %vm232_vm6, %v182_v32, %v248_v37  ;;  %v4882_v32 = vld [vmem:[%s5695_s2 + $0x68] sm:$0xff]   ;;  %v4887_v37 = vld [vmem:[%s5695_s2 + $0x90] sm:$0xff]  }
  0xe8   :  { %v267_v42 = vsel %vm235_vm7, %v193_v35, %v251_v39  ;;  %v4885_v35 = vld [vmem:[%s5695_s2 + $0x80] sm:$0xff]   ;;  %vm3042_vm7 = vcmask 91136  }
  0xe9   :  { %v4362_v43 = vpop.f32.mrb[8].mxu0  ;;  %4371 = vmatpush3.bf16.msra.mxu1 %v277_v28  ;;  %v265_v45 = vsel %vm233_vm8, %v185_v38, %v249_v40  ;;  %v279_v46 = vpack.c.bf16 %v267_v42, %v266_v41  ;;  %v4878_v28 = vld [vmem:[%s5695_s2 + $0x48] sm:$0xff]   ;;  %v4888_v38 = vld [vmem:[%s5695_s2 + $0x98] sm:$0xff]   ;;  %v4889_v39 = vld [vmem:[%s5695_s2 + $0xa0] sm:$0xff]  }
  0xea   :  { %v206_v47 = vadd.f32 %v4362_v43, %v5081_v10  ;;  %v197_v48 = vpop.f32.mrb[9].mxu0  ;;  %v278_v49 = vpack.c.bf16 %v265_v45, %v264_v44  ;;  %v4890_v40 = vld [vmem:[%s5695_s2 + $0xa8] sm:$0xff]   ;;  %v4891_v41 = vld [vmem:[%s5695_s2 + $0xb0] sm:$0xff]   ;;  %v4892_v42 = vld [vmem:[%s5695_s2 + $0xb8] sm:$0xff]  }
  0xeb   :  { %v198_v50 = vadd.f32 %v5081_v10, %v197_v48  ;;  %v4363_v51 = vpop.f32.mrb[10].mxu0  ;;  %v4893_v43 = vld [vmem:[%s5695_s2 + $0xc0] sm:$0xff]   ;;  %v4894_v44 = vld [vmem:[%s5695_s2 + $0xc8] sm:$0xff]   ;;  %v4895_v45 = vld [vmem:[%s5695_s2 + $0xd0] sm:$0xff]  }
  0xec   :  { %v254_v52 = vmul.f32 0.2, %v206_v47  ;;  %v209_v53 = vadd.f32 %v4363_v51, %v5081_v10  ;;  %v200_v54 = vpop.f32.mrb[11].mxu0  ;;  %4372 = vmatprep.subr.bf16.mxu1 %v278_v49  ;;  %vm238_vm9 = vcmp.gt.f32.partialorder %v206_v47, 0.0  ;;  %v4902_v48 = vld [vmem:[%s5696_s3 + $0x8] sm:$0xff]   ;;  %v4900_v51 = vld [vmem:[%s5695_s2 + $0xf8] sm:$0xff]  }
  0xed   :  { %v252_v55 = vmul.f32 0.2, %v198_v50  ;;  %v201_v56 = vadd.f32 %v5081_v10, %v200_v54  ;;  %4373 = vmatpush3.bf16.msra.mxu1 %v278_v49  ;;  %vm236_vm10 = vcmp.gt.f32.partialorder %v198_v50, 0.0  ;;  %4454 = vmatprep.subr.bf16.mxu0 %v4902_v48  ;;  %v4898_v49 = vld [vmem:[%s5695_s2 + $0xe8] sm:$0xff]  }
  0xee   :  { %vm239_vm11 = vcmp.gt.f32.partialorder %v209_v53, 0.0  ;;  %v255_v57 = vmul.f32 0.2, %v209_v53  ;;  %4374 = vmatprep.subr.bf16.mxu1 %v279_v46  ;;  %v270_v59 = vsel %vm238_vm9, %v206_v47, %v254_v52  ;;  %v4897_v47 = vld [vmem:[%s5695_s2 + $0xe0] sm:$0xff]   ;;  %vm3074_vm9 = vcmask 1043456  }
  0xef   :  { %vm237_vm12 = vcmp.gt.f32.partialorder %v201_v56, 0.0  ;;  %v253_v58 = vmul.f32 0.2, %v201_v56  ;;  %v268_v62 = vsel %vm236_vm10, %v198_v50, %v252_v55  ;;  %v4899_v50 = vld [vmem:[%s5695_s2 + $0xf0] sm:$0xff]   ;;  %vm5004_vm10 = vmmov 1  }
  0xf0   :  { %v271_v60 = vsel %vm239_vm11, %v209_v53, %v255_v57  ;;  %vm5535_vm11 = vmpackc.low %vm3074_vm9, %vm5004_vm10 }
  0xf1   :  { %v4366_v61 = vpop.f32.mrb[12].mxu0  ;;  %4375 = vmatpush3.bf16.msra.mxu1 %v279_v46  ;;  %v269_v63 = vsel %vm237_vm12, %v201_v56, %v253_v58  ;;  %v281_v0 = vpack.c.bf16 %v271_v60, %v270_v59  ;;  %v4896_v46 = vld [vmem:[%s5695_s2 + $0xd8] sm:$0xff]  }
  0xf2   :  { %v222_v1 = vadd.f32 %v4366_v61, %v5081_v10  ;;  %v213_v2 = vpop.f32.mrb[13].mxu0  ;;  %v280_v3 = vpack.c.bf16 %v269_v63, %v268_v62 }
  0xf3   :  { %v214_v4 = vadd.f32 %v5081_v10, %v213_v2  ;;  %v4367_v5 = vpop.f32.mrb[14].mxu0 }
  0xf4   :  { %v258_v6 = vmul.f32 0.2, %v222_v1  ;;  %v225_v7 = vadd.f32 %v4367_v5, %v5081_v10  ;;  %v216_v8 = vpop.f32.mrb[15].mxu0  ;;  %4376 = vmatprep.subr.bf16.mxu1 %v280_v3  ;;  %vm242_vm13 = vcmp.gt.f32.partialorder %v222_v1, 0.0 }
  0xf5   :  { %v256_v9 = vmul.f32 0.2, %v214_v4  ;;  %v217_v11 = vadd.f32 %v5081_v10, %v216_v8  ;;  %4377 = vmatpush3.bf16.msra.mxu1 %v280_v3  ;;  %vm240_vm14 = vcmp.gt.f32.partialorder %v214_v4, 0.0  ;;  %v4870_v10 = vld [vmem:[%s5695_s2 + $0x8] sm:$0xff]  }
  0xf6   :  { %vm243_vm15 = vcmp.gt.f32.partialorder %v225_v7, 0.0  ;;  %v259_v12 = vmul.f32 0.2, %v225_v7  ;;  %4378 = vmatprep.subr.bf16.mxu1 %v281_v0  ;;  %v274_v14 = vsel %vm242_vm13, %v222_v1, %v258_v6  ;;  %vm3070_vm13 = vcmask 97280  }
  0xf7   :  { %vm241_vm1 = vcmp.gt.f32.partialorder %v217_v11, 0.0  ;;  %v257_v13 = vmul.f32 0.2, %v217_v11  ;;  %v272_v16 = vsel %vm240_vm14, %v214_v4, %v256_v9 }
  0xf8   :  { %v275_v15 = vsel %vm243_vm15, %v225_v7, %v259_v12  ;;  %v4903_v7 = vld [vmem:[%s5696_s3 + $0x18] sm:$0xff]  }
  0xf9   :  { %4379 = vmatpush3.bf16.msra.mxu1 %v281_v0  ;;  %v273_v17 = vsel %vm241_vm1, %v217_v11, %v257_v13  ;;  %v283_v18 = vpack.c.bf16 %v275_v15, %v274_v14 }
  0xfa   :  { %v282_v19 = vpack.c.bf16 %v273_v17, %v272_v16 }
  0xfc   :  { %4380 = vmatprep.subr.bf16.mxu1 %v282_v19 }
  0xfd   :  { %4381 = vmatpush3.bf16.msra.mxu1 %v282_v19  ;;  %v4904_v19 = vld [vmem:[%s5696_s3 + $0x20] sm:$0xff]  }
  0xfe   :  { %4382 = vmatprep.subr.bf16.mxu1 %v283_v18 }
 0x101   :  { %4383 = vmatpush3.bf16.msra.mxu1 %v283_v18 }
 0x104   :  { %4385 = vmatmul.mubr.bf16.vlgmr.msra.gmra.mrb[0].mxu1 %v4870_v10 }
 0x105   :  { %4388 = vmatprep.mubr.bf16.mxu1 %v4871_v21 }
 0x10c   :  { %4389 = vmatmul.mubr.bf16.gmra.mrb[4].mxu1 %v4872_v22 }
 0x10d   :  { %4392 = vmatprep.mubr.bf16.mxu1 %v4873_v23 }
 0x114   :  { %4393 = vmatmul.mubr.bf16.gmra.mrb[8].mxu1 %v4874_v24 }
 0x115   :  { %4396 = vmatprep.mubr.bf16.mxu1 %v4875_v25 }
 0x11c   :  { %4397 = vmatmul.mubr.bf16.gmra.mrb[12].mxu1 %v4876_v26 }
 0x11d   :  { %4400 = vmatprep.mubr.bf16.mxu1 %v4877_v27 }
 0x124   :  { %4401 = vmatmul.mubr.bf16.gmra.mrb[16].mxu1 %v4878_v28 }
 0x125   :  { %4404 = vmatprep.mubr.bf16.mxu1 %v4879_v29 }
 0x12c   :  { %4405 = vmatmul.mubr.bf16.gmra.mrb[20].mxu1 %v4880_v30 }
 0x12d   :  { %4408 = vmatprep.mubr.bf16.mxu1 %v4881_v31 }
 0x134   :  { %4409 = vmatmul.mubr.bf16.gmra.mrb[24].mxu1 %v4882_v32  ;;  %v4905_v32 = vld [vmem:[%s5696_s3 + $0x28] sm:$0xff]  }
 0x135   :  { %4412 = vmatprep.mubr.bf16.mxu1 %v4883_v33 }
 0x13c   :  { %4413 = vmatmul.mubr.bf16.gmra.mrb[28].mxu1 %v4884_v34 }
 0x13d   :  { %4416 = vmatprep.mubr.bf16.mxu1 %v4885_v35 }
 0x144   :  { %4417 = vmatmul.mubr.bf16.gmra.mrb[32].mxu1 %v4886_v36 }
 0x145   :  { %4420 = vmatprep.mubr.bf16.mxu1 %v4887_v37 }
 0x14c   :  { %4421 = vmatmul.mubr.bf16.gmra.mrb[36].mxu1 %v4888_v38 }
 0x14d   :  { %4424 = vmatprep.mubr.bf16.mxu1 %v4889_v39 }
 0x154   :  { %4425 = vmatmul.mubr.bf16.gmra.mrb[40].mxu1 %v4890_v40 }
 0x155   :  { %4428 = vmatprep.mubr.bf16.mxu1 %v4891_v41 }
 0x15c   :  { %4429 = vmatmul.mubr.bf16.gmra.mrb[44].mxu1 %v4892_v42  ;;  %v4906_v42 = vld [vmem:[%s5696_s3 + $0x30] sm:$0xff]  }
 0x15d   :  { %4432 = vmatprep.mubr.bf16.mxu1 %v4893_v43 }
 0x164   :  { %4433 = vmatmul.mubr.bf16.gmra.mrb[48].mxu1 %v4894_v44 }
 0x165   :  { %4436 = vmatprep.mubr.bf16.mxu1 %v4895_v45 }
 0x16c   :  { %4437 = vmatmul.mubr.bf16.gmra.mrb[52].mxu1 %v4896_v46 }
 0x16d   :  { %4440 = vmatprep.mubr.bf16.mxu1 %v4897_v47 }
 0x174   :  { %4441 = vmatmul.mubr.bf16.gmra.mrb[56].mxu1 %v4898_v49 }
 0x175   :  { %4444 = vmatprep.mubr.bf16.mxu1 %v4899_v50 }
 0x17c   :  { %4445 = vmatmul.mubr.bf16.gmra.mrb[60].mxu1 %v4900_v51 }
 0x1d7   :  { %v4386_v52 = vpop.f32.mrb[0].mxu1 }
 0x1d8   :  { %v574_v53 = vpop.f32.mrb[1].mxu1 }
 0x1d9   :  { %v4387_v54 = vpop.f32.mrb[2].mxu1 }
 0x1da   :  { %v830_v55 = vpack.c.bf16 %v4387_v54, %v4386_v52  ;;  %v577_v56 = vpop.f32.mrb[3].mxu1 }
 0x1db   :  { %v829_v57 = vpack.c.bf16 %v577_v56, %v574_v53  ;;  %v4907_v56 = vld [vmem:[%s5696_s3 + $0x38] sm:$0xff]  }
 0x1dc   :  { %862 = vst.msk [vmem:[#allocation2 + $0x8] sm:$0xff] %vm106_vm0, %v830_v55 }
 0x1dd   :  { %861 = vst.msk [vmem:[#allocation2] sm:$0xff] %vm106_vm0, %v829_v57 }
 0x1df   :  { %v4390_v58 = vpop.f32.mrb[4].mxu1 }
 0x1e0   :  { %v590_v59 = vpop.f32.mrb[5].mxu1 }
 0x1e1   :  { %v4391_v60 = vpop.f32.mrb[6].mxu1 }
 0x1e2   :  { %v832_v61 = vpack.c.bf16 %v4391_v60, %v4390_v58  ;;  %v593_v62 = vpop.f32.mrb[7].mxu1 }
 0x1e3   :  { %v831_v63 = vpack.c.bf16 %v593_v62, %v590_v59  ;;  %v894_v10 = vld [vmem:[#allocation2 + $0x8] sm:$0xff] }
 0x1e4   :  { %864 = vst.msk [vmem:[#allocation2 + $0x18] sm:$0xff] %vm106_vm0, %v832_v61  ;;  %v893_v9 = vld [vmem:[#allocation2] sm:$0xff] }
 0x1e5   :  { %863 = vst.msk [vmem:[#allocation2 + $0x10] sm:$0xff] %vm106_vm0, %v831_v63  ;;  %v4917_v63 = vld [vmem:[%s5696_s3 + $0x98] sm:$0xff]  }
 0x1e7   :  { %v4394_v0 = vpop.f32.mrb[8].mxu1 }
 0x1e8   :  { %v606_v1 = vpop.f32.mrb[9].mxu1 }
 0x1e9   :  { %v4395_v2 = vpop.f32.mrb[10].mxu1 }
 0x1ea   :  { %v834_v3 = vpack.c.bf16 %v4395_v2, %v4394_v0  ;;  %v609_v4 = vpop.f32.mrb[11].mxu1 }
 0x1eb   :  { %v833_v5 = vpack.c.bf16 %v609_v4, %v606_v1  ;;  %v898_v8 = vld [vmem:[#allocation2 + $0x18] sm:$0xff]  ;;  %v5001_v1 = vmov 0.0   ;;  %v4908_v4 = vld [vmem:[%s5696_s3 + $0x40] sm:$0xff]  }
 0x1ec   :  { %v897_v6 = vld [vmem:[#allocation2 + $0x10] sm:$0xff]  ;;  %866 = vst.msk [vmem:[#allocation2 + $0x28] sm:$0xff] %vm106_vm0, %v834_v3  ;;  %4544 = vmatprep.subr.bf16.mxu1 %v5001_v1 }
 0x1ed   :  { %4450 = vmatprep.mubr.msk.bf16.mxu0 %vm106_vm0, %v897_v6  ;;  %865 = vst.msk [vmem:[#allocation2 + $0x20] sm:$0xff] %vm106_vm0, %v833_v5  ;;  %4545 = vmatpush3.bf16.msra.mxu1 %v4917_v63  ;;  %v4916_v63 = vld [vmem:[%s5696_s3 + $0x80] sm:$0xff]  }
 0x1ee   :  { %4451 = vmatmul.mubr.msk.bf16.vlgmr.msra.gmra.mrb[16].mxu0 %vm106_vm0, %v898_v8  ;;  %4546 = vmatprep.subr.bf16.mxu1 %v5001_v1 }
 0x1ef   :  { %4455 = vmatpush3.bf16.msra.mxu0 %v4902_v48  ;;  %4456 = vmatprep.mubr.msk.bf16.mxu0 %vm106_vm0, %v893_v9  ;;  %v4398_v11 = vpop.f32.mrb[12].mxu1 }
 0x1f0   :  { %4460 = vmatprep.subr.bf16.mxu0 %v4903_v7  ;;  %v622_v12 = vpop.f32.mrb[13].mxu1 }
 0x1f1   :  { %v4399_v13 = vpop.f32.mrb[14].mxu1 }
 0x1f2   :  { %v836_v14 = vpack.c.bf16 %v4399_v13, %v4398_v11  ;;  %v625_v15 = vpop.f32.mrb[15].mxu1 }
 0x1f3   :  { %v835_v16 = vpack.c.bf16 %v625_v15, %v622_v12  ;;  %v1024_v33 = vld [vmem:[#allocation2 + $0x28] sm:$0xff] }
 0x1f4   :  { %868 = vst.msk [vmem:[#allocation2 + $0x38] sm:$0xff] %vm106_vm0, %v836_v14  ;;  %v1023_v18 = vld [vmem:[#allocation2 + $0x20] sm:$0xff] }
 0x1f5   :  { %867 = vst.msk [vmem:[#allocation2 + $0x30] sm:$0xff] %vm106_vm0, %v835_v16 }
 0x1f7   :  { %v4402_v17 = vpop.f32.mrb[16].mxu1 }
 0x1f8   :  { %v638_v20 = vpop.f32.mrb[17].mxu1 }
 0x1f9   :  { %v4403_v21 = vpop.f32.mrb[18].mxu1 }
 0x1fa   :  { %4457 = vmatmul.mubr.msk.bf16.vlgmr.msra.gmra.mrb[16].mxu0 %vm106_vm0, %v894_v10  ;;  %v838_v22 = vpack.c.bf16 %v4403_v21, %v4402_v17  ;;  %v641_v23 = vpop.f32.mrb[19].mxu1 }
 0x1fb   :  { %4461 = vmatpush3.bf16.msra.mxu0 %v4903_v7  ;;  %4462 = vmatprep.mubr.msk.bf16.mxu0 %vm106_vm0, %v1023_v18  ;;  %v837_v24 = vpack.c.bf16 %v641_v23, %v638_v20  ;;  %v1093_v44 = vld [vmem:[#allocation2 + $0x38] sm:$0xff] }
 0x1fc   :  { %4466 = vmatprep.subr.bf16.mxu0 %v4904_v19  ;;  %870 = vst.msk [vmem:[#allocation2 + $0x48] sm:$0xff] %vm106_vm0, %v838_v22  ;;  %v1092_v31 = vld [vmem:[#allocation2 + $0x30] sm:$0xff] }
 0x1fd   :  { %869 = vst.msk [vmem:[#allocation2 + $0x40] sm:$0xff] %vm106_vm0, %v837_v24 }
 0x1ff   :  { %v4406_v25 = vpop.f32.mrb[20].mxu1 }
 0x200   :  { %v654_v26 = vpop.f32.mrb[21].mxu1 }
 0x201   :  { %v4407_v27 = vpop.f32.mrb[22].mxu1 }
 0x202   :  { %v840_v28 = vpack.c.bf16 %v4407_v27, %v4406_v25  ;;  %v657_v29 = vpop.f32.mrb[23].mxu1 }
 0x203   :  { %v839_v30 = vpack.c.bf16 %v657_v29, %v654_v26  ;;  %v1162_v57 = vld [vmem:[#allocation2 + $0x48] sm:$0xff] }
 0x204   :  { %872 = vst.msk [vmem:[#allocation2 + $0x58] sm:$0xff] %vm106_vm0, %v840_v28  ;;  %v1161_v41 = vld [vmem:[#allocation2 + $0x40] sm:$0xff]  ;;  %v4910_v28 = vld [vmem:[%s5696_s3 + $0x50] sm:$0xff]  }
 0x205   :  { %871 = vst.msk [vmem:[#allocation2 + $0x50] sm:$0xff] %vm106_vm0, %v839_v30 }
 0x206   :  { %4463 = vmatmul.mubr.msk.bf16.vlgmr.msra.gmra.mrb[16].mxu0 %vm106_vm0, %v1024_v33 }
 0x207   :  { %4467 = vmatpush3.bf16.msra.mxu0 %v4904_v19  ;;  %4468 = vmatprep.mubr.msk.bf16.mxu0 %vm106_vm0, %v1092_v31  ;;  %v4410_v34 = vpop.f32.mrb[24].mxu1  ;;  %v4909_v19 = vld [vmem:[%s5696_s3 + $0x48] sm:$0xff]  }
 0x208   :  { %4472 = vmatprep.subr.bf16.mxu0 %v4905_v32  ;;  %v670_v35 = vpop.f32.mrb[25].mxu1 }
 0x209   :  { %v4411_v36 = vpop.f32.mrb[26].mxu1 }
 0x20a   :  { %v842_v37 = vpack.c.bf16 %v4411_v36, %v4410_v34  ;;  %v673_v38 = vpop.f32.mrb[27].mxu1 }
 0x20b   :  { %v841_v39 = vpack.c.bf16 %v673_v38, %v670_v35  ;;  %v1231_v6 = vld [vmem:[#allocation2 + $0x58] sm:$0xff] }
 0x20c   :  { %874 = vst.msk [vmem:[#allocation2 + $0x68] sm:$0xff] %vm106_vm0, %v842_v37  ;;  %v1230_v55 = vld [vmem:[#allocation2 + $0x50] sm:$0xff] }
 0x20d   :  { %873 = vst.msk [vmem:[#allocation2 + $0x60] sm:$0xff] %vm106_vm0, %v841_v39 }
 0x20f   :  { %v4414_v40 = vpop.f32.mrb[28].mxu1 }
 0x210   :  { %v686_v43 = vpop.f32.mrb[29].mxu1 }
 0x211   :  { %v4415_v45 = vpop.f32.mrb[30].mxu1 }
 0x212   :  { %4469 = vmatmul.mubr.msk.bf16.vlgmr.msra.gmra.mrb[16].mxu0 %vm106_vm0, %v1093_v44  ;;  %v844_v46 = vpack.c.bf16 %v4415_v45, %v4414_v40  ;;  %v689_v47 = vpop.f32.mrb[31].mxu1 }
 0x213   :  { %4473 = vmatpush3.bf16.msra.mxu0 %v4905_v32  ;;  %4474 = vmatprep.mubr.msk.bf16.mxu0 %vm106_vm0, %v1161_v41  ;;  %v843_v48 = vpack.c.bf16 %v689_v47, %v686_v43  ;;  %v1300_v20 = vld [vmem:[#allocation2 + $0x68] sm:$0xff] }
 0x214   :  { %4478 = vmatprep.subr.bf16.mxu0 %v4906_v42  ;;  %876 = vst.msk [vmem:[#allocation2 + $0x78] sm:$0xff] %vm106_vm0, %v844_v46  ;;  %v1299_v3 = vld [vmem:[#allocation2 + $0x60] sm:$0xff] }
 0x215   :  { %875 = vst.msk [vmem:[#allocation2 + $0x70] sm:$0xff] %vm106_vm0, %v843_v48 }
 0x217   :  { %v4418_v49 = vpop.f32.mrb[32].mxu1 }
 0x218   :  { %v702_v50 = vpop.f32.mrb[33].mxu1 }
 0x219   :  { %v4419_v51 = vpop.f32.mrb[34].mxu1 }
 0x21a   :  { %v846_v52 = vpack.c.bf16 %v4419_v51, %v4418_v49  ;;  %v705_v53 = vpop.f32.mrb[35].mxu1  ;;  %v4912_v51 = vld [vmem:[%s5696_s3 + $0x60] sm:$0xff]  }
 0x21b   :  { %v845_v54 = vpack.c.bf16 %v705_v53, %v702_v50  ;;  %v1369_v30 = vld [vmem:[#allocation2 + $0x78] sm:$0xff] }
 0x21c   :  { %878 = vst.msk [vmem:[#allocation2 + $0x88] sm:$0xff] %vm106_vm0, %v846_v52  ;;  %v1368_v18 = vld [vmem:[#allocation2 + $0x70] sm:$0xff] }
 0x21d   :  { %877 = vst.msk [vmem:[#allocation2 + $0x80] sm:$0xff] %vm106_vm0, %v845_v54  ;;  %v4913_v54 = vld [vmem:[%s5696_s3 + $0x68] sm:$0xff]  }
 0x21e   :  { %4475 = vmatmul.mubr.msk.bf16.vlgmr.msra.gmra.mrb[16].mxu0 %vm106_vm0, %v1162_v57  ;;  %v4914_v57 = vld [vmem:[%s5696_s3 + $0x70] sm:$0xff]  }
 0x21f   :  { %4479 = vmatpush3.bf16.msra.mxu0 %v4906_v42  ;;  %4480 = vmatprep.mubr.msk.bf16.mxu0 %vm106_vm0, %v1230_v55  ;;  %v4422_v58 = vpop.f32.mrb[36].mxu1  ;;  %v4911_v42 = vld [vmem:[%s5696_s3 + $0x58] sm:$0xff]  }
 0x220   :  { %4484 = vmatprep.subr.bf16.mxu0 %v4907_v56  ;;  %v718_v59 = vpop.f32.mrb[37].mxu1 }
 0x221   :  { %v4423_v60 = vpop.f32.mrb[38].mxu1 }
 0x222   :  { %v848_v61 = vpack.c.bf16 %v4423_v60, %v4422_v58  ;;  %v721_v62 = vpop.f32.mrb[39].mxu1  ;;  %v4915_v60 = vld [vmem:[%s5696_s3 + $0x78] sm:$0xff]  }
 0x223   :  { %v847_v0 = vpack.c.bf16 %v721_v62, %v718_v59  ;;  %v1438_v43 = vld [vmem:[#allocation2 + $0x88] sm:$0xff] }
 0x224   :  { %880 = vst.msk [vmem:[#allocation2 + $0x98] sm:$0xff] %vm106_vm0, %v848_v61  ;;  %v1437_v27 = vld [vmem:[#allocation2 + $0x80] sm:$0xff] }
 0x225   :  { %879 = vst.msk [vmem:[#allocation2 + $0x90] sm:$0xff] %vm106_vm0, %v847_v0 }
 0x227   :  { %v4426_v2 = vpop.f32.mrb[40].mxu1 }
 0x228   :  { %v734_v5 = vpop.f32.mrb[41].mxu1 }
 0x229   :  { %v4427_v7 = vpop.f32.mrb[42].mxu1 }
 0x22a   :  { %4481 = vmatmul.mubr.msk.bf16.vlgmr.msra.gmra.mrb[16].mxu0 %vm106_vm0, %v1231_v6  ;;  %v850_v8 = vpack.c.bf16 %v4427_v7, %v4426_v2  ;;  %v737_v9 = vpop.f32.mrb[43].mxu1  ;;  %v4920_v6 = vld [vmem:[%s5696_s3 + $0x90] sm:$0xff]   ;;  %v4918_v7 = vld [vmem:[%s5696_s3 + $0xa0] sm:$0xff]  }
 0x22b   :  { %4485 = vmatpush3.bf16.msra.mxu0 %v4907_v56  ;;  %4486 = vmatprep.mubr.msk.bf16.mxu0 %vm106_vm0, %v1299_v3  ;;  %v849_v11 = vpack.c.bf16 %v737_v9, %v734_v5  ;;  %v1507_v52 = vld [vmem:[#allocation2 + $0x98] sm:$0xff]  ;;  %v4919_v5 = vld [vmem:[%s5696_s3 + $0x88] sm:$0xff]  }
 0x22c   :  { %4490 = vmatprep.subr.bf16.mxu0 %v4908_v4  ;;  %882 = vst.msk [vmem:[#allocation2 + $0xa8] sm:$0xff] %vm106_vm0, %v850_v8  ;;  %v1506_v41 = vld [vmem:[#allocation2 + $0x90] sm:$0xff]  ;;  %4547 = vmatpush3.bf16.msra.mxu1 %v4918_v7  ;;  %v4093_v8 = vld [vmem:[%s5697_s4 + $0x1] ss:$0 sm:$0xff]  ;;  %v4922_v7 = vld [vmem:[%s5696_s3 + $0xa8] sm:$0xff]  }
 0x22d   :  { %881 = vst.msk [vmem:[#allocation2 + $0xa0] sm:$0xff] %vm106_vm0, %v849_v11  ;;  %4560 = vmatprep.subr.bf16.mxu1 %v5001_v1 }
 0x22f   :  { %v4430_v12 = vpop.f32.mrb[44].mxu1 }
 0x230   :  { %v750_v13 = vpop.f32.mrb[45].mxu1 }
 0x231   :  { %v4431_v14 = vpop.f32.mrb[46].mxu1 }
 0x232   :  { %v852_v15 = vpack.c.bf16 %v4431_v14, %v4430_v12  ;;  %v753_v16 = vpop.f32.mrb[47].mxu1 }
 0x233   :  { %v851_v17 = vpack.c.bf16 %v753_v16, %v750_v13  ;;  %v1576_v55 = vld [vmem:[#allocation2 + $0xa8] sm:$0xff] }
 0x234   :  { %884 = vst.msk [vmem:[#allocation2 + $0xb8] sm:$0xff] %vm106_vm0, %v852_v15  ;;  %v1575_v50 = vld [vmem:[#allocation2 + $0xa0] sm:$0xff] }
 0x235   :  { %883 = vst.msk [vmem:[#allocation2 + $0xb0] sm:$0xff] %vm106_vm0, %v851_v17 }
 0x236   :  { %4487 = vmatmul.mubr.msk.bf16.vlgmr.msra.gmra.mrb[16].mxu0 %vm106_vm0, %v1300_v20 }
 0x237   :  { %4491 = vmatpush3.bf16.msra.mxu0 %v4908_v4  ;;  %4492 = vmatprep.mubr.msk.bf16.mxu0 %vm106_vm0, %v1368_v18  ;;  %v4434_v10 = vpop.f32.mrb[48].mxu1 }
 0x238   :  { %4496 = vmatprep.subr.bf16.mxu0 %v4909_v19  ;;  %v766_v21 = vpop.f32.mrb[49].mxu1 }
 0x239   :  { %v4435_v22 = vpop.f32.mrb[50].mxu1 }
 0x23a   :  { %v854_v23 = vpack.c.bf16 %v4435_v22, %v4434_v10  ;;  %v769_v24 = vpop.f32.mrb[51].mxu1 }
 0x23b   :  { %v853_v25 = vpack.c.bf16 %v769_v24, %v766_v21  ;;  %v1645_v58 = vld [vmem:[#allocation2 + $0xb8] sm:$0xff] }
 0x23c   :  { %886 = vst.msk [vmem:[#allocation2 + $0xc8] sm:$0xff] %vm106_vm0, %v854_v23  ;;  %v1644_v53 = vld [vmem:[#allocation2 + $0xb0] sm:$0xff] }
 0x23d   :  { %885 = vst.msk [vmem:[#allocation2 + $0xc0] sm:$0xff] %vm106_vm0, %v853_v25 }
 0x23f   :  { %v4438_v26 = vpop.f32.mrb[52].mxu1 }
 0x240   :  { %v782_v29 = vpop.f32.mrb[53].mxu1 }
 0x241   :  { %v4439_v31 = vpop.f32.mrb[54].mxu1 }
 0x242   :  { %4493 = vmatmul.mubr.msk.bf16.vlgmr.msra.gmra.mrb[16].mxu0 %vm106_vm0, %v1369_v30  ;;  %v856_v32 = vpack.c.bf16 %v4439_v31, %v4438_v26  ;;  %v785_v33 = vpop.f32.mrb[55].mxu1 }
 0x243   :  { %4497 = vmatpush3.bf16.msra.mxu0 %v4909_v19  ;;  %4498 = vmatprep.mubr.msk.bf16.mxu0 %vm106_vm0, %v1437_v27  ;;  %v855_v34 = vpack.c.bf16 %v785_v33, %v782_v29  ;;  %v1714_v61 = vld [vmem:[#allocation2 + $0xc8] sm:$0xff] }
 0x244   :  { %4502 = vmatprep.subr.bf16.mxu0 %v4910_v28  ;;  %888 = vst.msk [vmem:[#allocation2 + $0xd8] sm:$0xff] %vm106_vm0, %v856_v32  ;;  %v1713_v56 = vld [vmem:[#allocation2 + $0xc0] sm:$0xff] }
 0x245   :  { %887 = vst.msk [vmem:[#allocation2 + $0xd0] sm:$0xff] %vm106_vm0, %v855_v34 }
 0x247   :  { %v4442_v35 = vpop.f32.mrb[56].mxu1 }
 0x248   :  { %v798_v36 = vpop.f32.mrb[57].mxu1 }
 0x249   :  { %v4443_v37 = vpop.f32.mrb[58].mxu1 }
 0x24a   :  { %v858_v38 = vpack.c.bf16 %v4443_v37, %v4442_v35  ;;  %v801_v39 = vpop.f32.mrb[59].mxu1 }
 0x24b   :  { %v857_v40 = vpack.c.bf16 %v801_v39, %v798_v36  ;;  %v1783_v0 = vld [vmem:[#allocation2 + $0xd8] sm:$0xff] }
 0x24c   :  { %890 = vst.msk [vmem:[#allocation2 + $0xe8] sm:$0xff] %vm106_vm0, %v858_v38  ;;  %v1782_v59 = vld [vmem:[#allocation2 + $0xd0] sm:$0xff] }
 0x24d   :  { %889 = vst.msk [vmem:[#allocation2 + $0xe0] sm:$0xff] %vm106_vm0, %v857_v40 }
 0x24e   :  { %4499 = vmatmul.mubr.msk.bf16.vlgmr.msra.gmra.mrb[16].mxu0 %vm106_vm0, %v1438_v43 }
 0x24f   :  { %4503 = vmatpush3.bf16.msra.mxu0 %v4910_v28  ;;  %4504 = vmatprep.mubr.msk.bf16.mxu0 %vm106_vm0, %v1506_v41  ;;  %v4446_v44 = vpop.f32.mrb[60].mxu1 }
 0x250   :  { %4508 = vmatprep.subr.bf16.mxu0 %v4911_v42  ;;  %v814_v45 = vpop.f32.mrb[61].mxu1 }
 0x251   :  { %v4447_v46 = vpop.f32.mrb[62].mxu1 }
 0x252   :  { %v860_v47 = vpack.c.bf16 %v4447_v46, %v4446_v44  ;;  %v817_v48 = vpop.f32.mrb[63].mxu1 }
 0x253   :  { %v859_v49 = vpack.c.bf16 %v817_v48, %v814_v45  ;;  %v1852_v3 = vld [vmem:[#allocation2 + $0xe8] sm:$0xff] }
 0x254   :  { %892 = vst.msk [vmem:[#allocation2 + $0xf8] sm:$0xff] %vm106_vm0, %v860_v47  ;;  %v1851_v62 = vld [vmem:[#allocation2 + $0xe0] sm:$0xff] }
 0x255   :  { %891 = vst.msk [vmem:[#allocation2 + $0xf0] sm:$0xff] %vm106_vm0, %v859_v49 }
 0x25a   :  { %4505 = vmatmul.mubr.msk.bf16.vlgmr.msra.gmra.mrb[16].mxu0 %vm106_vm0, %v1507_v52 }
 0x25b   :  { %4509 = vmatpush3.bf16.msra.mxu0 %v4911_v42  ;;  %4510 = vmatprep.mubr.msk.bf16.mxu0 %vm106_vm0, %v1575_v50  ;;  %v1921_v4 = vld [vmem:[#allocation2 + $0xf8] sm:$0xff] }
 0x25c   :  { %4514 = vmatprep.subr.bf16.mxu0 %v4912_v51  ;;  %v1920_v2 = vld [vmem:[#allocation2 + $0xf0] sm:$0xff] }
 0x266   :  { %4511 = vmatmul.mubr.msk.bf16.vlgmr.msra.gmra.mrb[16].mxu0 %vm106_vm0, %v1576_v55 }
 0x267   :  { %4515 = vmatpush3.bf16.msra.mxu0 %v4912_v51  ;;  %4516 = vmatprep.mubr.msk.bf16.mxu0 %vm106_vm0, %v1644_v53 }
 0x268   :  { %4520 = vmatprep.subr.bf16.mxu0 %v4913_v54 }
 0x272   :  { %4517 = vmatmul.mubr.msk.bf16.vlgmr.msra.gmra.mrb[16].mxu0 %vm106_vm0, %v1645_v58 }
 0x273   :  { %4521 = vmatpush3.bf16.msra.mxu0 %v4913_v54  ;;  %4522 = vmatprep.mubr.msk.bf16.mxu0 %vm106_vm0, %v1713_v56 }
 0x274   :  { %4526 = vmatprep.subr.bf16.mxu0 %v4914_v57 }
 0x27e   :  { %4523 = vmatmul.mubr.msk.bf16.vlgmr.msra.gmra.mrb[16].mxu0 %vm106_vm0, %v1714_v61 }
 0x27f   :  { %4527 = vmatpush3.bf16.msra.mxu0 %v4914_v57  ;;  %4528 = vmatprep.mubr.msk.bf16.mxu0 %vm106_vm0, %v1782_v59 }
 0x280   :  { %4532 = vmatprep.subr.bf16.mxu0 %v4915_v60 }
 0x28a   :  { %4529 = vmatmul.mubr.msk.bf16.vlgmr.msra.gmra.mrb[16].mxu0 %vm106_vm0, %v1783_v0 }
 0x28b   :  { %4533 = vmatpush3.bf16.msra.mxu0 %v4915_v60  ;;  %4534 = vmatprep.mubr.msk.bf16.mxu0 %vm106_vm0, %v1851_v62 }
 0x28c   :  { %4538 = vmatprep.subr.bf16.mxu0 %v4916_v63 }
 0x296   :  { %4535 = vmatmul.mubr.msk.bf16.vlgmr.msra.gmra.mrb[16].mxu0 %vm106_vm0, %v1852_v3  ;;  %v4921_v3 = vld [vmem:[%s5696_s3 + $0xb8] sm:$0xff]  }
 0x297   :  { %4539 = vmatpush3.bf16.msra.mxu0 %v4916_v63  ;;  %4540 = vmatprep.mubr.msk.bf16.mxu0 %vm106_vm0, %v1920_v2 }
 0x298   :  { %4552 = vmatprep.subr.bf16.mxu0 %v5001_v1 }
 0x2a2   :  { %4541 = vmatmul.mubr.msk.bf16.vlgmr.msra.gmra.mrb[16].mxu0 %vm106_vm0, %v1921_v4  ;;  %vm5002_vm0 = vmmov 0  }
 0x2a3   :  { %4553 = vmatpush3.bf16.msra.mxu0 %v4919_v5  ;;  %4556 = vmatprep.mubr.msk.bf16.mxu0 %vm5002_vm0, %v5001_v1 }
 0x2a4   :  { %4554 = vmatprep.subr.bf16.mxu0 %v5001_v1  ;;  %4548 = vmatprep.mubr.msk.bf16.mxu1 %vm5002_vm0, %v5001_v1 }
 0x2a7   :  { %4555 = vmatpush3.bf16.msra.mxu0 %v4920_v6 }
 0x2a8   :  { %4568 = vmatprep.subr.bf16.mxu0 %v5001_v1 }
 0x375   :  { %v4542_v9 = vpop.f32.mrb[16].mxu0 }
 0x376   :  { %v1970_v11 = vpop.f32.mrb[17].mxu0  ;;  %v1995_v15 = vadd.f32 %v4542_v9, %v4093_v8  ;;  %v4923_v9 = vld [vmem:[%s5696_s3 + $0xc0] sm:$0xff]  }
 0x377   :  { %v1993_v12 = vadd.f32 %v4093_v8, %v1970_v11  ;;  %v4543_v13 = vpop.f32.mrb[18].mxu0  ;;  %v4924_v11 = vld [vmem:[%s5696_s3 + $0xb0] sm:$0xff]  }
 0x378   :  { %v1973_v14 = vpop.f32.mrb[19].mxu0  ;;  %v1996_v18 = vadd.f32 %v4543_v13, %v4093_v8  ;;  %v2001_v10 = vsel %vm1997_vm2, %v1995_v15, 0.0 }
 0x379   :  { %v1994_v16 = vadd.f32 %v4093_v8, %v1973_v14  ;;  %v1998_v17 = vsel %vm1997_vm2, %v1993_v12, 0.0  ;;  %v4926_v14 = vld [vmem:[%s5696_s3 + $0xc8] sm:$0xff]  }
 0x37a   :  { %v2003_v22 = vsel %vm1997_vm2, %v1996_v18, 0.0 }
 0x37b   :  { %v1999_v19 = vsel %vm1997_vm2, %v1994_v16, 0.0 }
 0x37c   :  { %v2000_v20 = vadd.f32 %v1999_v19, %v1998_v17  ;;  %v4928_v17 = vld [vmem:[%s5696_s3 + $0xd0] sm:$0xff]  }
 0x37e   :  { %v2002_v21 = vadd.f32 %v2001_v10, %v2000_v20  ;;  %v4930_v20 = vld [vmem:[%s5696_s3 + $0xe8] sm:$0xff]  }
 0x380   :  { %v2004_v23 = vadd.f32 %v2003_v22, %v2002_v21  ;;  %v4931_v21 = vld [vmem:[%s5696_s3 + $0x100] sm:$0xff]   ;;  %v4932_v22 = vld [vmem:[%s5696_s3 + $0xf0] sm:$0xff]  }
 0x382   :  { %v2005_v24 = vrot.slane %v2004_v23, 4 }
 0x384   :  { %v2006_v25 = vadd.f32 %v2005_v24, %v2004_v23  ;;  %v4933_v23 = vld [vmem:[%s5696_s3 + $0x118] sm:$0xff]  }
 0x386   :  { %v2007_v26 = vrot.slane %v2006_v25, 2 }
 0x388   :  { %v2008_v27 = vadd.f32 %v2007_v26, %v2006_v25  ;;  %v4934_v25 = vld [vmem:[%s5696_s3 + $0x108] sm:$0xff]  }
 0x38a   :  { %v2009_v28 = vrot.slane %v2008_v27, 1 }
 0x38c   :  { %v2010_v29 = vadd.f32 %v2009_v28, %v2008_v27  ;;  %v4935_v27 = vld [vmem:[%s5696_s3 + $0x120] sm:$0xff]   ;;  %v4936_v28 = vld [vmem:[%s5696_s3 + $0x110] sm:$0xff]  }
 0x38e   :  { %v2012_v30 = vmul.f32 0.03125, %v2010_v29  ;;  %v4937_v29 = vld [vmem:[%s5696_s3 + $0x138] sm:$0xff]  }
 0x390   :  { %v2013_v31 = vsub.f32 %v1993_v12, %v2012_v30  ;;  %v2014_v32 = vsub.f32 %v1994_v16, %v2012_v30  ;;  %v2015_v33 = vsub.f32 %v1995_v15, %v2012_v30  ;;  %v2016_v34 = vsub.f32 %v1996_v18, %v2012_v30  ;;  %v4925_v12 = vld [vmem:[%s5696_s3 + $0xd8] sm:$0xff]   ;;  %v4927_v16 = vld [vmem:[%s5696_s3 + $0xe0] sm:$0xff]  }
 0x391   :  { %v4929_v18 = vld [vmem:[%s5696_s3 + $0xf8] sm:$0xff]  }
 0x392   :  { %v2017_v35 = vmul.f32 %v2013_v31, %v2013_v31  ;;  %v2018_v36 = vmul.f32 %v2014_v32, %v2014_v32  ;;  %v2019_v37 = vmul.f32 %v2015_v33, %v2015_v33  ;;  %v2020_v38 = vmul.f32 %v2016_v34, %v2016_v34 }
 0x394   :  { %v2021_v39 = vsel %vm1997_vm2, %v2017_v35, 0.0  ;;  %v2022_v40 = vsel %vm1997_vm2, %v2018_v36, 0.0  ;;  %v2024_v42 = vsel %vm1997_vm2, %v2019_v37, 0.0  ;;  %v2026_v44 = vsel %vm1997_vm2, %v2020_v38, 0.0  ;;  %v4942_v36 = vld [vmem:[%s5696_s3 + $0x148] sm:$0xff]   ;;  %v4943_v38 = vld [vmem:[%s5696_s3 + $0x160] sm:$0xff]  }
 0x395   :  { %v2023_v41 = vadd.f32 %v2022_v40, %v2021_v39  ;;  %v4944_v39 = vld [vmem:[%s5696_s3 + $0x150] sm:$0xff]   ;;  %v4945_v40 = vld [vmem:[%s5696_s3 + $0x178] sm:$0xff]  }
 0x397   :  { %v2025_v43 = vadd.f32 %v2024_v42, %v2023_v41  ;;  %v4946_v42 = vld [vmem:[%s5696_s3 + $0x168] sm:$0xff]  }
 0x399   :  { %v2027_v45 = vadd.f32 %v2026_v44, %v2025_v43  ;;  %v4947_v44 = vld [vmem:[%s5696_s3 + $0x180] sm:$0xff]  }
 0x39b   :  { %v2028_v46 = vrot.slane %v2027_v45, 4 }
 0x39d   :  { %v2029_v47 = vadd.f32 %v2028_v46, %v2027_v45  ;;  %v4948_v45 = vld [vmem:[%s5696_s3 + $0x170] sm:$0xff]  }
 0x39f   :  { %v2030_v48 = vrot.slane %v2029_v47, 2 }
 0x3a1   :  { %v2031_v49 = vadd.f32 %v2030_v48, %v2029_v47 }
 0x3a3   :  { %v2032_v50 = vrot.slane %v2031_v49, 1 }
 0x3a5   :  { %v2033_v51 = vadd.f32 %v2032_v50, %v2031_v49 }
 0x3a7   :  { %v2034_v52 = vmul.f32 0.03125, %v2033_v51 }
 0x3a9   :  { %v2035_v53 = vadd.f32 1e-05, %v2034_v52 }
 0x3ab   :  { %4949 = vrsqrt.f32 %v2035_v53 }
 0x3b5   :  { %v4950_v54 = vpop.eup %4949 }
 0x3b6   :  { %v2037_v55 = vmul.f32 %v4950_v54, %v2013_v31  ;;  %v2038_v56 = vmul.f32 %v4950_v54, %v2014_v32  ;;  %v2039_v57 = vmul.f32 %v4950_v54, %v2015_v33  ;;  %v2040_v58 = vmul.f32 %v4950_v54, %v2016_v34  ;;  %v4938_v31 = vld [vmem:[%s5696_s3 + $0x128] sm:$0xff]   ;;  %v4939_v32 = vld [vmem:[%s5696_s3 + $0x140] sm:$0xff]   ;;  %v4940_v33 = vld [vmem:[%s5696_s3 + $0x130] sm:$0xff]  }
 0x3b7   :  { %v4941_v34 = vld [vmem:[%s5696_s3 + $0x158] sm:$0xff]  }
 0x3b8   :  { %vm2041_vm3 = vcmp.gt.f32.partialorder %v2037_v55, 0.0  ;;  %vm2042_vm4 = vcmp.gt.f32.partialorder %v2038_v56, 0.0  ;;  %vm2043_vm5 = vcmp.gt.f32.partialorder %v2039_v57, 0.0  ;;  %vm2044_vm6 = vcmp.gt.f32.partialorder %v2040_v58, 0.0 }
 0x3b9   :  { %v2045_v59 = vmul.f32 0.2, %v2037_v55  ;;  %v2046_v60 = vmul.f32 0.2, %v2038_v56  ;;  %v2047_v61 = vmul.f32 0.2, %v2039_v57 }
 0x3ba   :  { %v2048_v62 = vmul.f32 0.2, %v2040_v58 }
 0x3bb   :  { %v2049_v63 = vsel %vm2041_vm3, %v2037_v55, %v2045_v59  ;;  %v2050_v0 = vsel %vm2042_vm4, %v2038_v56, %v2046_v60  ;;  %v2051_v2 = vsel %vm2043_vm5, %v2039_v57, %v2047_v61 }
 0x3bc   :  { %v2052_v4 = vsel %vm2044_vm6, %v2040_v58, %v2048_v62  ;;  %v5340_v5 = vpack.c.bf16 %v2050_v0, %v2049_v63 }
 0x3bd   :  { %v5342_v6 = vpack.c.bf16 %v2052_v4, %v2051_v2 }
 0x3be   :  { %4557 = vmatmul.mubr.msk.bf16.vlgmr.msra.gmra.mrb[20].mxu0 %vm1997_vm2, %v5340_v5  ;;  %v2064_v8 = vrot.slane %v5340_v5, 1  ;;  %v2240_v13 = vrot.slane %v5340_v5, 3  ;;  %v2179_v15 = vrot.slane %v5340_v5, 2  ;;  %v2362_v19 = vrot.slane %v5340_v5, 5 }
 0x3bf   :  { %4569 = vmatpush3.bf16.msra.mxu0 %v4921_v3  ;;  %4572 = vmatprep.mubr.msk.bf16.mxu0 %vm5002_vm0, %v5001_v1  ;;  %v2301_v10 = vrot.slane %v5340_v5, 4  ;;  %v2484_v24 = vrot.slane %v5340_v5, 7  ;;  %v2423_v26 = vrot.slane %v5340_v5, 6  ;;  %v2606_v30 = vrot.slane %v5342_v6, 1 }
 0x3c0   :  { %4549 = vmatmul.mubr.msk.bf16.vlgmr.msra.gmra.mrb[64].mxu1 %vm1997_vm2, %v2064_v8  ;;  %4570 = vmatprep.subr.bf16.mxu0 %v5001_v1  ;;  %v2728_v35 = vrot.slane %v5342_v6, 3  ;;  %v2667_v37 = vrot.slane %v5342_v6, 2  ;;  %v2850_v41 = vrot.slane %v5342_v6, 5  ;;  %v2789_v43 = vrot.slane %v5342_v6, 4 }
 0x3c1   :  { %4561 = vmatpush3.bf16.msra.mxu1 %v4922_v7  ;;  %4564 = vmatprep.mubr.msk.bf16.mxu1 %vm5002_vm0, %v5001_v1  ;;  %v2972_v46 = vrot.slane %v5342_v6, 7  ;;  %v2911_v47 = vrot.slane %v5342_v6, 6 }
 0x3c2   :  { %4562 = vmatprep.subr.bf16.mxu1 %v5001_v1 }
 0x3c3   :  { %4571 = vmatpush3.bf16.msra.mxu0 %v4923_v9 }
 0x3c4   :  { %4584 = vmatprep.subr.bf16.mxu0 %v5001_v1 }
 0x3c5   :  { %4563 = vmatpush3.bf16.msra.mxu1 %v4924_v11 }
 0x3c6   :  { %4573 = vmatmul.mubr.msk.bf16.vlgmr.msra.gmra.mrb[24].mxu0 %vm1997_vm2, %v2240_v13  ;;  %4576 = vmatprep.subr.bf16.mxu1 %v5001_v1 }
 0x3c7   :  { %4585 = vmatpush3.bf16.msra.mxu0 %v4925_v12  ;;  %4588 = vmatprep.mubr.msk.bf16.mxu0 %vm5002_vm0, %v5001_v1 }
 0x3c8   :  { %4565 = vmatmul.mubr.msk.bf16.vlgmr.msra.gmra.mrb[68].mxu1 %vm1997_vm2, %v2179_v15  ;;  %4586 = vmatprep.subr.bf16.mxu0 %v5001_v1 }
 0x3c9   :  { %4577 = vmatpush3.bf16.msra.mxu1 %v4926_v14  ;;  %4580 = vmatprep.mubr.msk.bf16.mxu1 %vm5002_vm0, %v5001_v1 }
 0x3ca   :  { %4578 = vmatprep.subr.bf16.mxu1 %v5001_v1 }
 0x3cb   :  { %4587 = vmatpush3.bf16.msra.mxu0 %v4927_v16 }
 0x3cc   :  { %4600 = vmatprep.subr.bf16.mxu0 %v5001_v1 }
 0x3cd   :  { %4579 = vmatpush3.bf16.msra.mxu1 %v4928_v17 }
 0x3ce   :  { %4589 = vmatmul.mubr.msk.bf16.vlgmr.msra.gmra.mrb[28].mxu0 %vm1997_vm2, %v2362_v19  ;;  %4592 = vmatprep.subr.bf16.mxu1 %v5001_v1 }
 0x3cf   :  { %4601 = vmatpush3.bf16.msra.mxu0 %v4929_v18  ;;  %4604 = vmatprep.mubr.msk.bf16.mxu0 %vm5002_vm0, %v5001_v1 }
 0x3d0   :  { %4581 = vmatmul.mubr.msk.bf16.vlgmr.msra.gmra.mrb[72].mxu1 %vm1997_vm2, %v2301_v10  ;;  %4602 = vmatprep.subr.bf16.mxu0 %v5001_v1 }
 0x3d1   :  { %4593 = vmatpush3.bf16.msra.mxu1 %v4930_v20  ;;  %4596 = vmatprep.mubr.msk.bf16.mxu1 %vm5002_vm0, %v5001_v1 }
 0x3d2   :  { %4594 = vmatprep.subr.bf16.mxu1 %v5001_v1 }
 0x3d3   :  { %4603 = vmatpush3.bf16.msra.mxu0 %v4931_v21 }
 0x3d4   :  { %4616 = vmatprep.subr.bf16.mxu0 %v5001_v1 }
 0x3d5   :  { %4595 = vmatpush3.bf16.msra.mxu1 %v4932_v22 }
 0x3d6   :  { %4605 = vmatmul.mubr.msk.bf16.vlgmr.msra.gmra.mrb[32].mxu0 %vm1997_vm2, %v2484_v24  ;;  %4608 = vmatprep.subr.bf16.mxu1 %v5001_v1 }
 0x3d7   :  { %4617 = vmatpush3.bf16.msra.mxu0 %v4933_v23  ;;  %4620 = vmatprep.mubr.msk.bf16.mxu0 %vm5002_vm0, %v5001_v1 }
 0x3d8   :  { %4597 = vmatmul.mubr.msk.bf16.vlgmr.msra.gmra.mrb[76].mxu1 %vm1997_vm2, %v2423_v26  ;;  %4618 = vmatprep.subr.bf16.mxu0 %v5001_v1 }
 0x3d9   :  { %4609 = vmatpush3.bf16.msra.mxu1 %v4934_v25  ;;  %4612 = vmatprep.mubr.msk.bf16.mxu1 %vm5002_vm0, %v5001_v1 }
 0x3da   :  { %4610 = vmatprep.subr.bf16.mxu1 %v5001_v1 }
 0x3db   :  { %4619 = vmatpush3.bf16.msra.mxu0 %v4935_v27 }
 0x3dc   :  { %4632 = vmatprep.subr.bf16.mxu0 %v5001_v1 }
 0x3dd   :  { %4611 = vmatpush3.bf16.msra.mxu1 %v4936_v28 }
 0x3de   :  { %4621 = vmatmul.mubr.msk.bf16.vlgmr.msra.gmra.mrb[36].mxu0 %vm1997_vm2, %v2606_v30  ;;  %4624 = vmatprep.subr.bf16.mxu1 %v5001_v1 }
 0x3df   :  { %4633 = vmatpush3.bf16.msra.mxu0 %v4937_v29  ;;  %4636 = vmatprep.mubr.msk.bf16.mxu0 %vm5002_vm0, %v5001_v1 }
 0x3e0   :  { %4613 = vmatmul.mubr.msk.bf16.vlgmr.msra.gmra.mrb[80].mxu1 %vm1997_vm2, %v5342_v6  ;;  %4634 = vmatprep.subr.bf16.mxu0 %v5001_v1 }
 0x3e1   :  { %4625 = vmatpush3.bf16.msra.mxu1 %v4938_v31  ;;  %4628 = vmatprep.mubr.msk.bf16.mxu1 %vm5002_vm0, %v5001_v1 }
 0x3e2   :  { %4626 = vmatprep.subr.bf16.mxu1 %v5001_v1 }
 0x3e3   :  { %4635 = vmatpush3.bf16.msra.mxu0 %v4939_v32 }
 0x3e4   :  { %4648 = vmatprep.subr.bf16.mxu0 %v5001_v1 }
 0x3e5   :  { %4627 = vmatpush3.bf16.msra.mxu1 %v4940_v33 }
 0x3e6   :  { %4637 = vmatmul.mubr.msk.bf16.vlgmr.msra.gmra.mrb[40].mxu0 %vm1997_vm2, %v2728_v35  ;;  %4640 = vmatprep.subr.bf16.mxu1 %v5001_v1 }
 0x3e7   :  { %4649 = vmatpush3.bf16.msra.mxu0 %v4941_v34  ;;  %4652 = vmatprep.mubr.msk.bf16.mxu0 %vm5002_vm0, %v5001_v1 }
 0x3e8   :  { %4629 = vmatmul.mubr.msk.bf16.vlgmr.msra.gmra.mrb[84].mxu1 %vm1997_vm2, %v2667_v37  ;;  %4650 = vmatprep.subr.bf16.mxu0 %v5001_v1 }
 0x3e9   :  { %4641 = vmatpush3.bf16.msra.mxu1 %v4942_v36  ;;  %4644 = vmatprep.mubr.msk.bf16.mxu1 %vm5002_vm0, %v5001_v1 }
 0x3ea   :  { %4642 = vmatprep.subr.bf16.mxu1 %v5001_v1 }
 0x3eb   :  { %4651 = vmatpush3.bf16.msra.mxu0 %v4943_v38 }
 0x3ec   :  { %4664 = vmatprep.subr.bf16.mxu0 %v5001_v1 }
 0x3ed   :  { %4643 = vmatpush3.bf16.msra.mxu1 %v4944_v39 }
 0x3ee   :  { %4653 = vmatmul.mubr.msk.bf16.vlgmr.msra.gmra.mrb[44].mxu0 %vm1997_vm2, %v2850_v41  ;;  %4656 = vmatprep.subr.bf16.mxu1 %v5001_v1 }
 0x3ef   :  { %4665 = vmatpush3.bf16.msra.mxu0 %v4945_v40  ;;  %4668 = vmatprep.mubr.msk.bf16.mxu0 %vm5002_vm0, %v5001_v1 }
 0x3f0   :  { %4645 = vmatmul.mubr.msk.bf16.vlgmr.msra.gmra.mrb[88].mxu1 %vm1997_vm2, %v2789_v43  ;;  %4666 = vmatprep.subr.bf16.mxu0 %v5001_v1 }
 0x3f1   :  { %4657 = vmatpush3.bf16.msra.mxu1 %v4946_v42  ;;  %4660 = vmatprep.mubr.msk.bf16.mxu1 %vm5002_vm0, %v5001_v1 }
 0x3f2   :  { %4658 = vmatprep.subr.bf16.mxu1 %v5001_v1 }
 0x3f3   :  { %4667 = vmatpush3.bf16.msra.mxu0 %v4947_v44 }
 0x3f5   :  { %4659 = vmatpush3.bf16.msra.mxu1 %v4948_v45 }
 0x3f6   :  { %4669 = vmatmul.mubr.msk.bf16.vlgmr.msra.gmra.mrb[48].mxu0 %vm1997_vm2, %v2972_v46 }
 0x3f7   :  { %4683 = vmatprep.mubr.msk.f32.mxu0 %vm5002_vm0, %v5001_v1 }
 0x3f8   :  { %4661 = vmatmul.mubr.msk.bf16.vlgmr.msra.gmra.mrb[92].mxu1 %vm1997_vm2, %v2911_v47 }
 0x3f9   :  { %4676 = vmatprep.mubr.msk.f32.mxu1 %vm5002_vm0, %v5001_v1 }
 0x491   :  { %v2169_v48 = vpop.f32.mrb[20].mxu0 }
 0x492   :  { %v4558_v49 = vpop.f32.mrb[21].mxu0 }
 0x493   :  { %v2114_v50 = vpop.f32.mrb[64].mxu1  ;;  %v2172_v51 = vpop.f32.mrb[22].mxu0 }
 0x494   :  { %v2170_v52 = vadd.f32 %v2169_v48, %v2114_v50  ;;  %v4550_v53 = vpop.f32.mrb[65].mxu1  ;;  %v4559_v54 = vpop.f32.mrb[23].mxu0 }
 0x495   :  { %v2117_v55 = vpop.f32.mrb[66].mxu1 }
 0x496   :  { %v4551_v56 = vpop.f32.mrb[67].mxu1 }
 0x499   :  { %v2290_v57 = vpop.f32.mrb[24].mxu0 }
 0x49a   :  { %v4574_v58 = vpop.f32.mrb[25].mxu0 }
 0x49b   :  { %v2229_v59 = vpop.f32.mrb[68].mxu1  ;;  %v2293_v60 = vpop.f32.mrb[26].mxu0 }
 0x49c   :  { %v2235_v61 = vadd.f32 %v2229_v59, %v2170_v52  ;;  %v4566_v62 = vpop.f32.mrb[69].mxu1  ;;  %v4575_v63 = vpop.f32.mrb[27].mxu0 }
 0x49d   :  { %v2232_v0 = vpop.f32.mrb[70].mxu1 }
 0x49e   :  { %v4567_v2 = vpop.f32.mrb[71].mxu1  ;;  %v2296_v3 = vadd.f32 %v2290_v57, %v2235_v61  ;;  %v4142_v61 = vld [vmem:[%s5697_s4 + $0x2] ss:$0 sm:$0xff] }
 0x4a1   :  { %v2412_v4 = vpop.f32.mrb[28].mxu0 }
 0x4a2   :  { %v4590_v5 = vpop.f32.mrb[29].mxu0 }
 0x4a3   :  { %v2351_v6 = vpop.f32.mrb[72].mxu1  ;;  %v2415_v7 = vpop.f32.mrb[30].mxu0 }
 0x4a4   :  { %v2357_v8 = vadd.f32 %v2351_v6, %v2296_v3  ;;  %v4582_v9 = vpop.f32.mrb[73].mxu1  ;;  %v4591_v11 = vpop.f32.mrb[31].mxu0  ;;  %v3040_v6 = vld [vmem:[%s5694_s1] sm:$0x3] }
 0x4a5   :  { %v2354_v12 = vpop.f32.mrb[74].mxu1  ;;  %v3046_v11 = vlaneseq }
 0x4a6   :  { %v4583_v13 = vpop.f32.mrb[75].mxu1  ;;  %v2418_v14 = vadd.f32 %v2412_v4, %v2357_v8 }
 0x4a7   :  { %v5522_v12 = vand.u32 127, %v3046_v11 }
 0x4a9   :  { %v2534_v15 = vpop.f32.mrb[32].mxu0 }
 0x4aa   :  { %v4606_v16 = vpop.f32.mrb[33].mxu0 }
 0x4ab   :  { %v2473_v17 = vpop.f32.mrb[76].mxu1  ;;  %v2537_v18 = vpop.f32.mrb[34].mxu0 }
 0x4ac   :  { %v2479_v19 = vadd.f32 %v2473_v17, %v2418_v14  ;;  %v4598_v20 = vpop.f32.mrb[77].mxu1  ;;  %v4607_v10 = vpop.f32.mrb[35].mxu0  ;;  %v26_v18 = vld [vmem:[%s5697_s4 + $0x8] sm:$0xff] }
 0x4ad   :  { %v2476_v21 = vpop.f32.mrb[78].mxu1  ;;  %v5003_v20 = vmov 0.0|0.0  }
 0x4ae   :  { %v4599_v22 = vpop.f32.mrb[79].mxu1  ;;  %v2540_v23 = vadd.f32 %v2534_v15, %v2479_v19  ;;  %v27_v19 = vld [vmem:[%s5697_s4 + $0x10] sm:$0xf]  ;;  %4747 = vmatprep.subr.bf16.mxu1 %v5003_v20  ;;  %4751 = vmatprep.subr.bf16.mxu0 %v5003_v20 }
 0x4af   :  { %v5533_v10 = vpack.c.bf16 %v27_v19, %v26_v18  ;;  %v4153_v19 = vld [vmem:[%s5694_s1 + $0x6] sm:$0x3] }
 0x4b1   :  { %v2656_v24 = vpop.f32.mrb[36].mxu0  ;;  %4750 = vmatpush3.bf16.msk.msra.mxu1 %vm5535_vm11, %v5533_v10  ;;  %4754 = vmatpush3.bf16.msk.msra.mxu0 %vm5535_vm11, %v5533_v10 }
 0x4b2   :  { %v4622_v25 = vpop.f32.mrb[37].mxu0  ;;  %4755 = vmatprep.subr.bf16.mxu1 %v5003_v20  ;;  %4759 = vmatprep.subr.bf16.mxu0 %v5003_v20 }
 0x4b3   :  { %v2594_v26 = vpop.f32.mrb[80].mxu1  ;;  %v2659_v27 = vpop.f32.mrb[38].mxu0 }
 0x4b4   :  { %v2600_v28 = vadd.f32 %v2594_v26, %v2540_v23  ;;  %v4614_v29 = vpop.f32.mrb[81].mxu1  ;;  %v4623_v30 = vpop.f32.mrb[39].mxu0 }
 0x4b5   :  { %v2597_v31 = vpop.f32.mrb[82].mxu1 }
 0x4b6   :  { %v4615_v32 = vpop.f32.mrb[83].mxu1  ;;  %v2662_v33 = vadd.f32 %v2656_v24, %v2600_v28 }
 0x4b7   :  { %v4145_v32 = vld [vmem:[%s5694_s1 + $0x2] sm:$0x3] }
 0x4b9   :  { %v2778_v34 = vpop.f32.mrb[40].mxu0 }
 0x4ba   :  { %v4638_v35 = vpop.f32.mrb[41].mxu0 }
 0x4bb   :  { %v2717_v36 = vpop.f32.mrb[84].mxu1  ;;  %v2781_v37 = vpop.f32.mrb[42].mxu0 }
 0x4bc   :  { %v2723_v38 = vadd.f32 %v2717_v36, %v2662_v33  ;;  %v4630_v39 = vpop.f32.mrb[85].mxu1  ;;  %v4639_v40 = vpop.f32.mrb[43].mxu0  ;;  %v5005_v37 = vmov 11  }
 0x4bd   :  { %v2720_v41 = vpop.f32.mrb[86].mxu1  ;;  %4858 = vset.pattern.permute.xlu0 %v5005_v37  ;;  %4859 = vset.pattern.permute.xlu1 %v5005_v37 }
 0x4be   :  { %v4631_v42 = vpop.f32.mrb[87].mxu1  ;;  %v2784_v43 = vadd.f32 %v2778_v34, %v2723_v38 }
 0x4c1   :  { %v2900_v44 = vpop.f32.mrb[44].mxu0 }
 0x4c2   :  { %v4654_v45 = vpop.f32.mrb[45].mxu0 }
 0x4c3   :  { %v2839_v46 = vpop.f32.mrb[88].mxu1  ;;  %v2903_v47 = vpop.f32.mrb[46].mxu0 }
 0x4c4   :  { %v2845_v48 = vadd.f32 %v2839_v46, %v2784_v43  ;;  %v4646_v49 = vpop.f32.mrb[89].mxu1  ;;  %v4655_v50 = vpop.f32.mrb[47].mxu0  ;;  %v5006_v43 = vmov 0  }
 0x4c5   :  { %v2842_v51 = vpop.f32.mrb[90].mxu1 }
 0x4c6   :  { %v4647_v52 = vpop.f32.mrb[91].mxu1  ;;  %v2906_v53 = vadd.f32 %v2900_v44, %v2845_v48 }
 0x4c9   :  { %v3022_v54 = vpop.f32.mrb[48].mxu0 }
 0x4ca   :  { %v4670_v55 = vpop.f32.mrb[49].mxu0 }
 0x4cb   :  { %v2961_v56 = vpop.f32.mrb[92].mxu1  ;;  %v3025_v57 = vpop.f32.mrb[50].mxu0 }
 0x4cc   :  { %v2967_v58 = vadd.f32 %v2961_v56, %v2906_v53  ;;  %v4662_v59 = vpop.f32.mrb[93].mxu1  ;;  %v4671_v60 = vpop.f32.mrb[51].mxu0  ;;  %v4149_v57 = vld [vmem:[%s5694_s1 + $0x4] sm:$0x3] }
 0x4cd   :  { %v2964_v62 = vpop.f32.mrb[94].mxu1 }
 0x4ce   :  { %v3028_v63 = vadd.f32 %v3022_v54, %v2967_v58  ;;  %v4663_v0 = vpop.f32.mrb[95].mxu1 }
 0x4d0   :  { %v3033_v2 = vadd.f32 %v4142_v61, %v3028_v63 }
 0x4d2   :  { %v4143_v3 = vmul.f32 -1.442695, %v3033_v2 }
 0x4d4   :  { %4951 = vpow2.f32 %v4143_v3 }
 0x4de   :  { %v4952_v4 = vpop.eup %4951 }
 0x4df   :  { %v3037_v5 = vadd.f32 1.0, %v4952_v4 }
 0x4e1   :  { %4953 = vrcp.f32 %v3037_v5 }
 0x4eb   :  { %v4954_v7 = vpop.eup %4953 }
 0x4ec   :  { %v3041_v8 = vadd.f32 %v4954_v7, %v3040_v6 }
 0x4ee   :  { %v3043_v9 = vsel %vm3042_vm7, %v3041_v8, -inf }
 0x4ef   :  { %3044 = vmax.xlane.f32.xlu0 %v3043_v9 }
 0x57c   :  { %v3045_v13 = vpop.xlane.xlu0 %3044 }
 0x57d   :  { %vm3048_vm8 = vcmp.eq.f32.partialorder %v3041_v8, %v3045_v13 }
 0x57e   :  { %v3049_v14 = vsel %vm3048_vm8, %v5522_v12, 12 }
 0x57f   :  { %v3050_v15 = vsel %vm3042_vm7, %v3049_v14, 2147483647 }
 0x580   :  { %v3052_v16 = vshra.s32 %v3050_v15, 16  ;;  %v3051_v22 = vand.u32 65535, %v3050_v15 }
 0x582   :  { %v3054_v17 = vcvt.s32.f32 %v3052_v16  ;;  %v3053_v24 = vcvt.s32.f32 %v3051_v22 }
 0x584   :  { %3055 = vmin.xlane.f32.xlu0 %v3054_v17 }
 0x611   :  { %v3056_v23 = vpop.xlane.xlu0 %3055 }
 0x612   :  { %vm3057_vm12 = vcmp.eq.f32.partialorder %v3054_v17, %v3056_v23  ;;  %v3062_v26 = vcvt.f32.s32 %v3056_v23 }
 0x613   :  { %v3058_v25 = vsel %vm3057_vm12, %v3053_v24, inf }
 0x614   :  { %3059 = vmin.xlane.f32.xlu1 %v3058_v25  ;;  %v3063_v28 = vshll.u32 %v3062_v26, 16 }
 0x6a1   :  { %v3060_v27 = vpop.xlane.xlu1 %3059 }
 0x6a2   :  { %v3061_v29 = vcvt.f32.s32 %v3060_v27 }
 0x6a4   :  { %v3064_v30 = vadd.s32 %v3063_v28, %v3061_v29 }
 0x6a6   :  { %vm3065_vm14 = vcmp.eq.s32.totalorder %v5522_v12, %v3064_v30 }
 0x6a7   :  { %v4144_v31 = vsel %vm3065_vm14, 1.0, %v5001_v1 }
 0x6a8   :  { %4677 = vmatmul.mubr.msk.f32.vlgmr.msra.gmra.mrb[96].mxu1 %vm3070_vm13, %v4144_v31  ;;  %vm3171_vm1 = vcmp.ne.f32.partialorder %v4144_v31, 0.0 }
 0x6a9   :  { %4758 = vmatpush3.bf16.msk.msra.mxu1 %vm5535_vm11, %v5533_v10  ;;  %4690 = vmatprep.mubr.msk.f32.mxu1 %vm5002_vm0, %v5001_v1  ;;  %v3172_v44 = vsel %vm3171_vm1, 1, %v5006_v43 }
 0x6aa   :  { %4763 = vmatprep.subr.bf16.mxu1 %v5003_v20 }
 0x77b   :  { %v3144_v33 = vpop.f32.mrb[96].mxu1 }
 0x77c   :  { %v3145_v34 = vadd.f32 %v4145_v32, %v3144_v33  ;;  %v4678_v35 = vpop.f32.mrb[97].mxu1 }
 0x77e   :  { %v3148_v36 = vsel %vm3042_vm7, %v3145_v34, -inf }
 0x77f   :  { %3149 = vmax.xlane.f32.xlu1 %v3148_v36 }
 0x80c   :  { %v3150_v38 = vpop.xlane.xlu1 %3149 }
 0x80d   :  { %vm3151_vm15 = vcmp.eq.f32.partialorder %v3145_v34, %v3150_v38 }
 0x80e   :  { %v3152_v39 = vsel %vm3151_vm15, %v5522_v12, 12 }
 0x80f   :  { %v3153_v40 = vsel %vm3042_vm7, %v3152_v39, 2147483647 }
 0x810   :  { %v3155_v41 = vshra.s32 %v3153_v40, 16  ;;  %v3154_v45 = vand.u32 65535, %v3153_v40 }
 0x812   :  { %v3157_v42 = vcvt.s32.f32 %v3155_v41  ;;  %v3156_v47 = vcvt.s32.f32 %v3154_v45  ;;  %v4157_v45 = vld [vmem:[%s5694_s1 + $0x8] sm:$0x3] }
 0x814   :  { %3158 = vmin.xlane.f32.xlu0 %v3157_v42 }
 0x82a   :  { %3174 = vperm.xlu0 %4858, %v3172_v44  }
 0x8a1   :  { %v3159_v46 = vpop.xlane.xlu0 %3158 }
 0x8a2   :  { %vm3160_vm3 = vcmp.eq.f32.partialorder %v3157_v42, %v3159_v46  ;;  %v3165_v49 = vcvt.f32.s32 %v3159_v46 }
 0x8a3   :  { %v3161_v48 = vsel %vm3160_vm3, %v3156_v47, inf }
 0x8a4   :  { %3162 = vmin.xlane.f32.xlu1 %v3161_v48  ;;  %v3166_v51 = vshll.u32 %v3165_v49, 16 }
 0x8a9   :  { %v3175_v53 = vpop.permute.xlu0 %3174 }
 0x8aa   :  { %vm3176_vm5 = vcmp.eq.s32.totalorder %v3175_v53, 1 }
 0x931   :  { %v3163_v50 = vpop.xlane.xlu1 %3162 }
 0x932   :  { %v3164_v52 = vcvt.f32.s32 %v3163_v50 }
 0x934   :  { %v3167_v54 = vadd.s32 %v3166_v51, %v3164_v52 }
 0x936   :  { %vm3168_vm4 = vcmp.eq.s32.totalorder %v5522_v12, %v3167_v54 }
 0x937   :  { %v4148_v55 = vsel %vm3168_vm4, 1.0, %v5001_v1 }
 0x938   :  { %v3177_v56 = vsel %vm3176_vm5, %v4144_v31, %v4148_v55 }
 0x939   :  { %4684 = vmatmul.mubr.msk.f32.vlgmr.msra.gmra.mrb[52].mxu0 %vm3070_vm13, %v3177_v56  ;;  %vm3276_vm9 = vcmp.ne.f32.partialorder %v3177_v56, 0.0 }
 0x93a   :  { %4762 = vmatpush3.bf16.msk.msra.mxu0 %vm5535_vm11, %v5533_v10  ;;  %4697 = vmatprep.mubr.msk.f32.mxu0 %vm5002_vm0, %v5001_v1  ;;  %v3277_v8 = vsel %vm3276_vm9, 1, %v5006_v43 }
 0x93b   :  { %4767 = vmatprep.subr.bf16.mxu0 %v5003_v20 }
 0xa0c   :  { %v3249_v58 = vpop.f32.mrb[52].mxu0 }
 0xa0d   :  { %v3250_v59 = vadd.f32 %v4149_v57, %v3249_v58  ;;  %v4685_v60 = vpop.f32.mrb[53].mxu0 }
 0xa0f   :  { %v3253_v61 = vsel %vm3042_vm7, %v3250_v59, -inf }
 0xa10   :  { %3254 = vmax.xlane.f32.xlu1 %v3253_v61 }
 0xa9d   :  { %v3255_v62 = vpop.xlane.xlu1 %3254 }
 0xa9e   :  { %vm3256_vm6 = vcmp.eq.f32.partialorder %v3250_v59, %v3255_v62 }
 0xa9f   :  { %v3257_v63 = vsel %vm3256_vm6, %v5522_v12, 12 }
 0xaa0   :  { %v3258_v0 = vsel %vm3042_vm7, %v3257_v63, 2147483647 }
 0xaa1   :  { %v3260_v2 = vshra.s32 %v3258_v0, 16  ;;  %v3259_v4 = vand.u32 65535, %v3258_v0 }
 0xaa3   :  { %v3262_v3 = vcvt.s32.f32 %v3260_v2  ;;  %v3261_v6 = vcvt.s32.f32 %v3259_v4  ;;  %v4161_v4 = vld [vmem:[%s5694_s1 + $0xa] sm:$0x3] }
 0xaa5   :  { %3263 = vmin.xlane.f32.xlu1 %v3262_v3 }
 0xb32   :  { %v3264_v5 = vpop.xlane.xlu1 %3263 }
 0xb33   :  { %vm3265_vm8 = vcmp.eq.f32.partialorder %v3262_v3, %v3264_v5  ;;  %v3270_v9 = vcvt.f32.s32 %v3264_v5 }
 0xb34   :  { %v3266_v7 = vsel %vm3265_vm8, %v3261_v6, inf }
 0xb35   :  { %3267 = vmin.xlane.f32.xlu1 %v3266_v7  ;;  %v3271_v13 = vshll.u32 %v3270_v9, 16 }
 0xb46   :  { %3279 = vperm.xlu1 %4859, %v3277_v8  }
 0xbc2   :  { %v3268_v11 = vpop.xlane.xlu1 %3267 }
 0xbc3   :  { %v3269_v14 = vcvt.f32.s32 %v3268_v11 }
 0xbc5   :  { %v3272_v15 = vadd.s32 %v3271_v13, %v3269_v14 }
 0xbc6   :  { %v3280_v16 = vpop.permute.xlu1 %3279 }
 0xbc7   :  { %vm3273_vm10 = vcmp.eq.s32.totalorder %v5522_v12, %v3272_v15  ;;  %vm3281_vm12 = vcmp.eq.s32.totalorder %v3280_v16, 1 }
 0xbc8   :  { %v4152_v17 = vsel %vm3273_vm10, 1.0, %v5001_v1 }
 0xbc9   :  { %v3282_v18 = vsel %vm3281_vm12, %v3177_v56, %v4152_v17 }
 0xbca   :  { %4691 = vmatmul.mubr.msk.f32.vlgmr.msra.gmra.mrb[98].mxu1 %vm3070_vm13, %v3282_v18  ;;  %vm3381_vm1 = vcmp.ne.f32.partialorder %v3282_v18, 0.0 }
 0xbcb   :  { %4766 = vmatpush3.bf16.msk.msra.mxu1 %vm5535_vm11, %v5533_v10  ;;  %4704 = vmatprep.mubr.msk.f32.mxu1 %vm5002_vm0, %v5001_v1  ;;  %v3382_v34 = vsel %vm3381_vm1, 1, %v5006_v43  ;;  %vm3966_vm1 = vcmask 74752  }
 0xbcc   :  { %4771 = vmatprep.subr.bf16.mxu1 %v5003_v20 }
 0xc9d   :  { %v3354_v22 = vpop.f32.mrb[98].mxu1 }
 0xc9e   :  { %v3355_v23 = vadd.f32 %v4153_v19, %v3354_v22  ;;  %v4692_v24 = vpop.f32.mrb[99].mxu1  ;;  %v30_v22 = vld [vmem:[%s5697_s4 + $0x28] sm:$0xff] }
 0xca0   :  { %v3358_v25 = vsel %vm3042_vm7, %v3355_v23, -inf }
 0xca1   :  { %3359 = vmax.xlane.f32.xlu1 %v3358_v25  ;;  %v28_v25 = vld [vmem:[%s5697_s4 + $0x18] sm:$0xff] }
 0xd2e   :  { %v3360_v26 = vpop.xlane.xlu1 %3359 }
 0xd2f   :  { %vm3361_vm14 = vcmp.eq.f32.partialorder %v3355_v23, %v3360_v26  ;;  %v31_v23 = vld [vmem:[%s5697_s4 + $0x30] sm:$0xff]  ;;  %v29_v26 = vld [vmem:[%s5697_s4 + $0x20] sm:$0xf] }
 0xd30   :  { %v3362_v27 = vsel %vm3361_vm14, %v5522_v12, 12  ;;  %v4772_v24 = vpack.c.bf16 %v31_v23, %v30_v22  ;;  %v4170_v22 = vld [vmem:[%s5697_s4 + $0x3] ss:$0 sm:$0xff] }
 0xd31   :  { %v3363_v10 = vsel %vm3042_vm7, %v3362_v27, 2147483647  ;;  %v32_v27 = vld [vmem:[%s5697_s4 + $0x38] sm:$0xff] }
 0xd32   :  { %v3365_v28 = vshra.s32 %v3363_v10, 16  ;;  %v3364_v30 = vand.u32 65535, %v3363_v10  ;;  %v4768_v10 = vpack.c.bf16 %v29_v26, %v28_v25 }
 0xd34   :  { %v3367_v29 = vcvt.s32.f32 %v3365_v28  ;;  %v3366_v32 = vcvt.s32.f32 %v3364_v30  ;;  %v33_v28 = vld [vmem:[%s5697_s4 + $0x40] sm:$0xff] }
 0xd36   :  { %3368 = vmin.xlane.f32.xlu0 %v3367_v29 }
 0xdc3   :  { %v3369_v31 = vpop.xlane.xlu0 %3368 }
 0xdc4   :  { %vm3370_vm15 = vcmp.eq.f32.partialorder %v3367_v29, %v3369_v31  ;;  %v3375_v35 = vcvt.f32.s32 %v3369_v31  ;;  %v4775_v29 = vpack.c.bf16 %v33_v28, %v32_v27 }
 0xdc5   :  { %v3371_v33 = vsel %vm3370_vm15, %v3366_v32, inf }
 0xdc6   :  { %3372 = vmin.xlane.f32.xlu1 %v3371_v33  ;;  %v3376_v37 = vshll.u32 %v3375_v35, 16 }
 0xdd7   :  { %3384 = vperm.xlu1 %4859, %v3382_v34  }
 0xe53   :  { %v3373_v36 = vpop.xlane.xlu1 %3372 }
 0xe54   :  { %v3374_v38 = vcvt.f32.s32 %v3373_v36 }
 0xe56   :  { %v3377_v39 = vadd.s32 %v3376_v37, %v3374_v38 }
 0xe57   :  { %v3385_v40 = vpop.permute.xlu1 %3384 }
 0xe58   :  { %vm3378_vm3 = vcmp.eq.s32.totalorder %v5522_v12, %v3377_v39  ;;  %vm3386_vm4 = vcmp.eq.s32.totalorder %v3385_v40, 1 }
 0xe59   :  { %v4156_v41 = vsel %vm3378_vm3, 1.0, %v5001_v1 }
 0xe5a   :  { %v3387_v42 = vsel %vm3386_vm4, %v3282_v18, %v4156_v41 }
 0xe5b   :  { %4698 = vmatmul.mubr.msk.f32.vlgmr.msra.gmra.mrb[54].mxu0 %vm3070_vm13, %v3387_v42  ;;  %vm3486_vm5 = vcmp.ne.f32.partialorder %v3387_v42, 0.0 }
 0xe5c   :  { %v3487_v44 = vsel %vm3486_vm5, 1, %v5006_v43  ;;  %4711 = vmatprep.mubr.msk.f32.mxu0 %vm5002_vm0, %v5001_v1  ;;  %4770 = vmatpush3.bf16.msk.msra.mxu0 %vm5535_vm11, %v4768_v10 }
 0xe5d   :  { %3489 = vperm.xlu1 %4859, %v3487_v44   ;;  %4777 = vmatprep.subr.bf16.mxu0 %v5003_v20 }
 0xedc   :  { %v3490_v63 = vpop.permute.xlu1 %3489 }
 0xedd   :  { %vm3491_vm10 = vcmp.eq.s32.totalorder %v3490_v63, 1 }
 0xf2e   :  { %v3459_v46 = vpop.f32.mrb[54].mxu0 }
 0xf2f   :  { %v3460_v47 = vadd.f32 %v4157_v45, %v3459_v46  ;;  %v4699_v48 = vpop.f32.mrb[55].mxu0 }
 0xf31   :  { %v3463_v49 = vsel %vm3042_vm7, %v3460_v47, -inf }
 0xf32   :  { %3464 = vmax.xlane.f32.xlu0 %v3463_v49 }
 0xfbf   :  { %v3465_v50 = vpop.xlane.xlu0 %3464 }
 0xfc0   :  { %vm3466_vm6 = vcmp.eq.f32.partialorder %v3460_v47, %v3465_v50 }
 0xfc1   :  { %v3467_v51 = vsel %vm3466_vm6, %v5522_v12, 12 }
 0xfc2   :  { %v3468_v52 = vsel %vm3042_vm7, %v3467_v51, 2147483647 }
 0xfc3   :  { %v3470_v53 = vshra.s32 %v3468_v52, 16  ;;  %v3469_v55 = vand.u32 65535, %v3468_v52 }
 0xfc5   :  { %v3472_v54 = vcvt.s32.f32 %v3470_v53  ;;  %v3471_v57 = vcvt.s32.f32 %v3469_v55 }
 0xfc7   :  { %3473 = vmin.xlane.f32.xlu0 %v3472_v54 }
0x1054   :  { %v3474_v56 = vpop.xlane.xlu0 %3473 }
0x1055   :  { %vm3475_vm8 = vcmp.eq.f32.partialorder %v3472_v54, %v3474_v56  ;;  %v3480_v59 = vcvt.f32.s32 %v3474_v56 }
0x1056   :  { %v3476_v58 = vsel %vm3475_vm8, %v3471_v57, inf }
0x1057   :  { %3477 = vmin.xlane.f32.xlu0 %v3476_v58  ;;  %v3481_v61 = vshll.u32 %v3480_v59, 16 }
0x10e4   :  { %v3478_v60 = vpop.xlane.xlu0 %3477 }
0x10e5   :  { %v3479_v62 = vcvt.f32.s32 %v3478_v60 }
0x10e7   :  { %v3482_v0 = vadd.s32 %v3481_v61, %v3479_v62 }
0x10e9   :  { %vm3483_vm9 = vcmp.eq.s32.totalorder %v5522_v12, %v3482_v0 }
0x10ea   :  { %v4160_v2 = vsel %vm3483_vm9, 1.0, %v5001_v1 }
0x10eb   :  { %v3492_v3 = vsel %vm3491_vm10, %v3387_v42, %v4160_v2 }
0x10ec   :  { %4705 = vmatmul.mubr.msk.f32.vlgmr.msra.gmra.mrb[100].mxu1 %vm3070_vm13, %v3492_v3  ;;  %vm3591_vm15 = vcmp.ne.f32.partialorder %v3492_v3, 0.0 }
0x10ed   :  { %4722 = vmatprep.mubr.msk.f32.mxu1 %vm5002_vm0, %v5001_v1  ;;  %4773 = vmatpush3.bf16.msra.mxu1 %v4772_v24  ;;  %v3592_v30 = vsel %vm3591_vm15, 1, %v5006_v43 }
0x10ee   :  { %4774 = vmatprep.subr.bf16.mxu1 %v5003_v20 }
0x10f1   :  { %4776 = vmatpush3.bf16.msra.mxu1 %v4775_v29 }
0x10f2   :  { %4783 = vmatprep.subr.bf16.mxu1 %v5003_v20 }
0x10f4   :  { %4723 = vmatmul.mubr.f32.vlgmr.msra.gmra.mrb[102].mxu1 %v5001_v1 }
0x10f5   :  { %4744 = vmatprep.mubr.msk.f32.mxu1 %vm5002_vm0, %v5001_v1 }
0x11bf   :  { %v3564_v5 = vpop.f32.mrb[100].mxu1 }
0x11c0   :  { %v3565_v6 = vadd.f32 %v4161_v4, %v3564_v5  ;;  %v4706_v7 = vpop.f32.mrb[101].mxu1 }
0x11c2   :  { %v3568_v8 = vsel %vm3042_vm7, %v3565_v6, -inf }
0x11c3   :  { %3569 = vmax.xlane.f32.xlu0 %v3568_v8  ;;  %v34_v8 = vld [vmem:[%s5697_s4 + $0x48] sm:$0xff] }
0x11c7   :  { %v3743_v37 = vpop.f32.mrb[102].mxu1 }
0x11c8   :  { %v4724_v38 = vpop.f32.mrb[103].mxu1 }
0x1250   :  { %v3570_v9 = vpop.xlane.xlu0 %3569 }
0x1251   :  { %vm3571_vm12 = vcmp.eq.f32.partialorder %v3565_v6, %v3570_v9  ;;  %v35_v9 = vld [vmem:[%s5697_s4 + $0x50] sm:$0xff] }
0x1252   :  { %v3572_v11 = vsel %vm3571_vm12, %v5522_v12, 12 }
0x1253   :  { %v3573_v13 = vsel %vm3042_vm7, %v3572_v11, 2147483647  ;;  %v36_v11 = vld [vmem:[%s5697_s4 + $0x58] sm:$0xff] }
0x1254   :  { %v3575_v14 = vshra.s32 %v3573_v13, 16  ;;  %v3574_v16 = vand.u32 65535, %v3573_v13  ;;  %v4784_v13 = vpack.c.bf16 %v35_v9, %v34_v8 }
0x1256   :  { %v3577_v15 = vcvt.s32.f32 %v3575_v14  ;;  %v3576_v18 = vcvt.s32.f32 %v3574_v16  ;;  %v37_v14 = vld [vmem:[%s5697_s4 + $0x60] sm:$0xff]  ;;  %4785 = vmatpush3.bf16.msra.mxu1 %v4784_v13  ;;  %s5009_s4 = smov [#allocation4]  }
0x1257   :  { %4786 = vmatprep.subr.bf16.mxu1 %v5003_v20  ;;  %s3987_s26 = sshll.u32 %s5009_s4, 4  ;;  %s3988_s26 = int_to_ptr.vmem [resolvable:$true] %s3987_s26 }
0x1258   :  { %3578 = vmin.xlane.f32.xlu1 %v3577_v15  ;;  %s4977_s27 = scalar_lea.vmem %s3988_s26, 32  ;;  %p4982_p1 = scmp.lt.s32.totalorder %s3988_s26, %s3988_s26 }
0x1259   :  { %p4978_p0 = scmp.ne.s32.totalorder %s3988_s26, %s4977_s27  ;;  %p4983_p2 = scmp.lt.s32.totalorder %s4977_s27, %s4977_s27 }
0x125b   :  { %p4984_p3 = por %p4983_p2, %p4982_p1 }
0x125d   :  { %p4985_p4 = pnand %p4984_p3, %p4978_p0 }
0x12e5   :  { %v3579_v17 = vpop.xlane.xlu1 %3578 }
0x12e6   :  { %vm3580_vm14 = vcmp.eq.f32.partialorder %v3577_v15, %v3579_v17  ;;  %v3585_v31 = vcvt.f32.s32 %v3579_v17  ;;  %v4787_v15 = vpack.c.bf16 %v37_v14, %v36_v11 }
0x12e7   :  { %v3581_v19 = vsel %vm3580_vm14, %v3576_v18, inf }
0x12e8   :  { %3582 = vmin.xlane.f32.xlu0 %v3581_v19  ;;  %v3586_v33 = vshll.u32 %v3585_v31, 16  ;;  %4788 = vmatpush3.bf16.msra.mxu1 %v4787_v15 }
0x12fe   :  { %3594 = vperm.xlu0 %4858, %v3592_v30  }
0x1375   :  { %v3583_v32 = vpop.xlane.xlu0 %3582 }
0x1376   :  { %v3584_v34 = vcvt.f32.s32 %v3583_v32 }
0x1378   :  { %v3587_v35 = vadd.s32 %v3586_v33, %v3584_v34 }
0x137a   :  { %vm3588_vm7 = vcmp.eq.s32.totalorder %v5522_v12, %v3587_v35 }
0x137b   :  { %v4164_v43 = vsel %vm3588_vm7, 1.0, %v5001_v1 }
0x137d   :  { %v3595_v21 = vpop.permute.xlu0 %3594 }
0x137e   :  { %vm3596_vm11 = vcmp.eq.s32.totalorder %v3595_v21, 1 }
0x137f   :  { %v3597_v36 = vsel %vm3596_vm11, %v3492_v3, %v4164_v43 }
0x1380   :  { %4712 = vmatmul.mubr.msk.f32.vlgmr.msra.gmra.mrb[56].mxu0 %vm3070_vm13, %v3597_v36  ;;  %vm3885_vm13 = vcmask 254977  }
0x1381   :  { %4779 = vmatpush3.bf16.msra.mxu0 %v4772_v24  ;;  %4733 = vmatprep.mubr.msk.f32.mxu0 %vm5002_vm0, %v5001_v1  ;;  %vm3776_vm0 = vcmask 253952  }
0x1382   :  { %4780 = vmatprep.subr.bf16.mxu0 %v5003_v20 }
0x1385   :  { %4782 = vmatpush3.bf16.msra.mxu0 %v4775_v29 }
0x1453   :  { %v3670_v39 = vpop.f32.mrb[56].mxu0 }
0x1454   :  { %v3747_v40 = vadd.f32 %v3743_v37, %v3670_v39  ;;  %v4713_v41 = vpop.f32.mrb[57].mxu0 }
0x1456   :  { %4955 = vtanh.f32 %v3747_v40  ;;  %v4167_v42 = vmul.f32 -1.442695, %v3747_v40 }
0x1458   :  { %4957 = vpow2.f32 %v4167_v42 }
0x1460   :  { %v4956_v12 = vpop.eup %4955 }
0x1461   :  { %3757 = vrot.lane.b32.xlu0 %v4956_v12, %s5007_s0 }
0x1462   :  { %v4958_v44 = vpop.eup %4957 }
0x1463   :  { %v3751_v45 = vadd.f32 1.0, %v4958_v44 }
0x1465   :  { %4959 = vrcp.f32 %v3751_v45 }
0x146f   :  { %v4960_v46 = vpop.eup %4959 }
0x1470   :  { %v3755_v48 = vmul.f32 0.0, %v4960_v46 }
0x14d3   :  { %v3758_v1 = vpop.permute.xlu0 %3757 }
0x14d4   :  { %v3760_v47 = vmul.f32 %v4960_v46, %v3758_v1 }
0x14d6   :  { %3762 = vrot.lane.b32.xlu0 %v3760_v47, %s5008_s15 }
0x1548   :  { %v3763_v49 = vpop.permute.xlu0 %3762 }
0x1549   :  { %v3765_v50 = vadd.f32 %v3763_v49, %v3755_v48 }
0x154b   :  { %4961 = vtanh.f32 %v3765_v50  ;;  %v3862_v3 = vrot.slane %v3765_v50, 7 }
0x1555   :  { %v4962_v51 = vpop.eup %4961 }
0x1556   :  { %3768 = vrot.lane.b32.xlu0 %v4962_v51, %s5007_s0 }
0x15c8   :  { %v3769_v52 = vpop.permute.xlu0 %3768 }
0x15c9   :  { %v3771_v53 = vmul.f32 %v4960_v46, %v3769_v52 }
0x15cb   :  { %3773 = vrot.lane.b32.xlu1 %v3771_v53, %s5008_s15 }
0x163d   :  { %v3774_v54 = vpop.permute.xlu1 %3773 }
0x163e   :  { %3777 = vst.msk [vmem:[#allocation3] sm:$0x1] %vm3776_vm0, %v3774_v54  ;;  %4734 = vmatmul.mubr.msk.f32.vlgmr.msra.gmra.mrb[58].mxu0 %vm1997_vm2, %v3774_v54 }
0x1711   :  { %v3846_v55 = vpop.f32.mrb[58].mxu0 }
0x1712   :  { %v3851_v56 = vrot.slane %v3846_v55, 7  ;;  %v4735_v57 = vpop.f32.mrb[59].mxu0 }
0x1714   :  { %v3853_v58 = vadd.f32 %v3851_v56, %v3670_v39 }
0x1716   :  { %4963 = vtanh.f32 %v3853_v58  ;;  %v4169_v60 = vmul.f32 -1.442695, %v3853_v58 }
0x1718   :  { %4965 = vpow2.f32 %v4169_v60 }
0x1720   :  { %v4964_v59 = vpop.eup %4963 }
0x1721   :  { %3866 = vrot.lane.b32.xlu0 %v4964_v59, %s5007_s0 }
0x1722   :  { %v4966_v61 = vpop.eup %4965 }
0x1723   :  { %v3857_v62 = vadd.f32 1.0, %v4966_v61 }
0x1725   :  { %4967 = vrcp.f32 %v3857_v62 }
0x172f   :  { %v4968_v63 = vpop.eup %4967 }
0x1730   :  { %v3864_v4 = vmul.f32 %v4968_v63, %v3862_v3 }
0x1793   :  { %v3867_v0 = vpop.permute.xlu0 %3866 }
0x1794   :  { %v3869_v2 = vmul.f32 %v4968_v63, %v3867_v0 }
0x1796   :  { %3871 = vrot.lane.b32.xlu0 %v3869_v2, %s5008_s15 }
0x1808   :  { %v3872_v5 = vpop.permute.xlu0 %3871 }
0x1809   :  { %v3874_v6 = vadd.f32 %v3872_v5, %v3864_v4 }
0x180b   :  { %4969 = vtanh.f32 %v3874_v6 }
0x1815   :  { %v4970_v7 = vpop.eup %4969 }
0x1816   :  { %3877 = vrot.lane.b32.xlu0 %v4970_v7, %s5007_s0 }
0x1888   :  { %v3878_v16 = vpop.permute.xlu0 %3877 }
0x1889   :  { %v3880_v17 = vmul.f32 %v4968_v63, %v3878_v16 }
0x188b   :  { %3882 = vrot.lane.b32.xlu0 %v3880_v17, %s5008_s15 }
0x18fd   :  { %v3883_v18 = vpop.permute.xlu0 %3882 }
0x18fe   :  { %3886 = vst.msk [vmem:[#allocation3] sm:$0x2] %vm3885_vm13, %v3883_v18 }
0x1905   :  { %v3887_v19 = vld [vmem:[#allocation3] sm:$0x3] }
0x1906   :  { %4745 = vmatmul.mubr.msk.f32.vlgmr.msra.gmra.mrb[104].mxu1 %vm1997_vm2, %v3887_v19 }
0x19d9   :  { %v3961_v23 = vpop.f32.mrb[104].mxu1 }
0x19da   :  { %v3962_v24 = vadd.f32 %v4170_v22, %v3961_v23  ;;  %v4746_v25 = vpop.f32.mrb[105].mxu1 }
0x19dc   :  { %4971 = vtanh.f32 %v3962_v24 }
0x19e6   :  { %v4972_v20 = vpop.eup %4971 }
0x19e7   :  { %v3967_v26 = vsel %vm3966_vm1, %v4972_v20, -inf }
0x19e8   :  { %3968 = vmax.xlane.f32.xlu1 %v3967_v26 }
0x1a75   :  { %v3969_v27 = vpop.xlane.xlu1 %3968 }
0x1a76   :  { %v3970_v10 = vsub.f32 %v4972_v20, %v3969_v27 }
0x1a78   :  { %v3971_v28 = vmul.f32 1.442695, %v3970_v10 }
0x1a7a   :  { %4973 = vpow2.f32 %v3971_v28 }
0x1a84   :  { %v4974_v29 = vpop.eup %4973 }
0x1a85   :  { %v3973_v30 = vsel %vm3966_vm1, %v4974_v29, 0.0 }
0x1a86   :  { %3974 = vadd.xlane.f32.xlu0 %v3973_v30 }
0x1b13   :  { %v3975_v31 = vpop.xlane.xlu0 %3974 }
0x1b14   :  { %4975 = vlog2.f32 %v3975_v31 }
0x1b1e   :  { %v4976_v32 = vpop.eup %4975 }
0x1b1f   :  { %v3977_v33 = vmul.f32 0.6931472, %v4976_v32 }
0x1b21   :  { %v3978_v34 = vadd.f32 %v3977_v33, %v3969_v27 }
0x1b23   :  { %v3979_v35 = vsub.f32 %v4972_v20, %v3978_v34 }
0x1b25   :  { %3980 = vst.msk [vmem:[#allocation4] sm:$0x3] %vm3966_vm1, %v3979_v35 }
0x1b26   :  { %4988 = shalt.err (!%p4985_p4)
}
0x1b27   :  { %s4989_s29 = scalar_lea.hbm %s5698_s5, 32 }
0x1b28   :  { %p4990_p5 = scmp.ne.s32.totalorder %s5698_s5, %s4989_s29  ;;  %p4993_p6 = scmp.lt.u32.totalorder %s4989_s29, %s5698_s5 }
0x1b2a   :  { %p4995_p7 = pnand %p4993_p6, %p4990_p5 }
0x1b2c   :  { %4998 = shalt.err (!%p4995_p7)
}
0x1b2d   :  { %3990 = dma.vmem_to_hbm [thread:$0]  %s3988_s26, 32, %s5698_s5, [#allocation5]  }
0x1b2e   :  { %4999 = dma.done.wait [#allocation5], 32  }
0x1b2f   :  { %5000 = vsyncadd [#allocation5], 4294967264 }
0x1b30   :  { %3994 = vsyncpa [#allocation5], 1 }

</bundles_post_ra>
